<compile_context>
chip_gen: v7x
topology: tpu7x:2x2x1
jax: 0.10.0
libtpu: 0.0.40
codegen_flags: <defaults>
</compile_context>

<pallas_src>
import functools
import math

import jax
import jax.numpy as jnp
from jax.experimental import pallas as pl
from jax.experimental.pallas import tpu as pltpu


# ----------------------------- shared math helpers ----------------------------------

def _layernorm(x, w, b, eps=1e-5):
    mu = jnp.mean(x, axis=-1, keepdims=True)
    xc = x - mu
    var = jnp.mean(xc * xc, axis=-1, keepdims=True)
    return xc * jax.lax.rsqrt(var + eps) * w + b


def _quick_gelu_ref(x):
    # CLIP's QuickGELU: x * sigmoid(1.702 * x)  (pure-JAX reference version)
    return x * (1.0 / (1.0 + jnp.exp(-1.702 * x)))


# ----------------------------- Pallas kernel ----------------------------------------

def _text_encoder_kernel(
    prompts_ref, pos_ref, deep_ref, sel_ref,
    ln1_w_ref, ln1_b_ref, w_qkv_ref, b_qkv_ref, w_o_ref, b_o_ref,
    ln2_w_ref, ln2_b_ref, w_fc1_ref, b_fc1_ref, w_fc2_ref, b_fc2_ref,
    lnf_w_ref, lnf_b_ref, proj_ref,
    out_ref,
    acc_ref,
    *, n_heads, n_ctx, n_deep):
    f32 = jnp.float32
    bf16 = jnp.bfloat16
    cb, seq, d = prompts_ref.shape          # classes in this block, seq, width
    rows = cb * seq
    hd = d // n_heads
    scale = 1.0 / math.sqrt(hd)

    l = pl.program_id(1)                    # layer index (grid axis, "arbitrary")
    n_layers = pl.num_programs(1)

    # ---- prologue (layer 0 only): x = prompts + positional_embedding ----
    @pl.when(l == 0)
    def _():
        x0 = prompts_ref[...].astype(f32) + pos_ref[...].astype(f32)[None]
        acc_ref[...] = x0.reshape(rows, d)

    # ---- deep prompt injection before blocks 1..n_deep: masked select (no concat) ----
    @pl.when((l >= 1) & (l <= n_deep))
    def _():
        pos_i = jax.lax.broadcasted_iota(jnp.int32, (1, seq, 1), 1)
        is_ctx = (pos_i >= 1) & (pos_i < 1 + n_ctx)
        dp = deep_ref[...].astype(f32)                       # (1, seq, d), zero-padded
        x3 = acc_ref[...].reshape(cb, seq, d)
        acc_ref[...] = jnp.where(is_ctx, dp, x3).reshape(rows, d)

    # ---- residual attention: x = x + attn(ln_1(x)) ----
    x = acc_ref[...]                                         # (rows, d) f32
    h = _layernorm(x, ln1_w_ref[0].astype(f32), ln1_b_ref[0].astype(f32))
    qkv = jnp.dot(h.astype(bf16), w_qkv_ref[0],
                  preferred_element_type=f32) + b_qkv_ref[0].astype(f32)
    q3 = qkv[:, :d].reshape(cb, seq, d)
    k3 = qkv[:, d:2 * d].reshape(cb, seq, d)
    v3 = qkv[:, 2 * d:].reshape(cb, seq, d)

    # Causal attention mask (f32; never in bf16).
    ri = jax.lax.broadcasted_iota(jnp.int32, (seq, seq), 0)
    ci_ = jax.lax.broadcasted_iota(jnp.int32, (seq, seq), 1)
    causal = jnp.where(ci_ <= ri, 0.0, -1e9).astype(f32)[None]     # (1, seq, seq)

    # Batched over classes (single batch dim — supported by Mosaic dot_general);
    # heads remain a short static loop.  One softmax per head over the whole
    # (cb, seq, seq) tensor, softmax denominator via EUP reciprocal.
    head_outs = []
    for hh in range(n_heads):
        sl = slice(hh * hd, (hh + 1) * hd)
        qh = q3[:, :, sl].astype(bf16)
        kh = k3[:, :, sl].astype(bf16)
        vh = v3[:, :, sl].astype(bf16)
        s = jax.lax.dot_general(qh, kh, (((2,), (2,)), ((0,), (0,))),
                                preferred_element_type=f32) * scale + causal
        m = jnp.max(s, axis=-1, keepdims=True)
        e = jnp.exp(s - m)
        p = e * pl.reciprocal(jnp.sum(e, axis=-1, keepdims=True), approx=True)
        head_outs.append(
            jax.lax.dot_general(p.astype(bf16), vh, (((2,), (1,)), ((0,), (0,))),
                                preferred_element_type=f32))
    attn = jnp.concatenate(head_outs, axis=-1).reshape(rows, d)
    attn = jnp.dot(attn.astype(bf16), w_o_ref[0],
                   preferred_element_type=f32) + b_o_ref[0].astype(f32)
    x = x + attn

    # ---- residual MLP: x = x + fc2(quick_gelu(fc1(ln_2(x)))) ----
    h2 = _layernorm(x, ln2_w_ref[0].astype(f32), ln2_b_ref[0].astype(f32))
    mid = jnp.dot(h2.astype(bf16), w_fc1_ref[0],
                  preferred_element_type=f32) + b_fc1_ref[0].astype(f32)
    mid = mid * pl.reciprocal(1.0 + jnp.exp(-1.702 * mid), approx=True)  # QuickGELU (EUP)
    x = x + jnp.dot(mid.astype(bf16), w_fc2_ref[0],
                    preferred_element_type=f32) + b_fc2_ref[0].astype(f32)
    acc_ref[...] = x

    # ---- epilogue (last layer only): ln_final, EOT select (block-diag one-hot), proj ----
    @pl.when(l == n_layers - 1)
    def _():
        xf = _layernorm(x, lnf_w_ref[...].astype(f32), lnf_b_ref[...].astype(f32))
        x_eot = jnp.dot(sel_ref[...], xf, preferred_element_type=f32)       # (cb, d)
        out_ref[...] = jnp.dot(x_eot.astype(bf16), proj_ref[...],
                               preferred_element_type=f32).astype(out_ref.dtype)


# ----------------------------- parameters & wrapper ----------------------------------

class TextEncoderParams:
    """Deterministic synthetic CLIP-text-tower weights (frozen in ProVP).

    Matmul weights are stored in bf16 (native MXU input dtype, half the DMA bytes);
    layernorm params, biases and the positional embedding stay f32 (added in f32)."""

    def __init__(self, key, *, n_cls=4, seq=8, width=32, heads=4, layers=2,
                 n_ctx=4, embed_dim=128, dtype=jnp.float32, mm_dtype=jnp.bfloat16):
        self.n_cls, self.seq, self.width = n_cls, seq, width
        self.heads, self.layers, self.n_ctx = heads, layers, n_ctx
        self.embed_dim = embed_dim
        d, L = width, layers
        ks = jax.random.split(key, 16)
        nrm = lambda k, shape, s=0.02: (s * jax.random.normal(k, shape)).astype(dtype)

        self.pos_emb = nrm(ks[0], (seq, d), 0.01)
        self.ln1_w = (1.0 + nrm(ks[1], (L, 1, d), 0.1)).astype(dtype)
        self.ln1_b = nrm(ks[2], (L, 1, d), 0.1)
        self.w_qkv = nrm(ks[3], (L, d, 3 * d)).astype(mm_dtype)
        self.b_qkv = nrm(ks[4], (L, 1, 3 * d))
        self.w_o = nrm(ks[5], (L, d, d)).astype(mm_dtype)
        self.b_o = nrm(ks[6], (L, 1, d))
        self.ln2_w = (1.0 + nrm(ks[7], (L, 1, d), 0.1)).astype(dtype)
        self.ln2_b = nrm(ks[8], (L, 1, d), 0.1)
        self.w_fc1 = nrm(ks[9], (L, d, 4 * d)).astype(mm_dtype)
        self.b_fc1 = nrm(ks[10], (L, 1, 4 * d))
        self.w_fc2 = nrm(ks[11], (L, 4 * d, d)).astype(mm_dtype)
        self.b_fc2 = nrm(ks[12], (L, 1, d))
        self.lnf_w = (1.0 + nrm(ks[13], (1, d), 0.1)).astype(dtype)
        self.lnf_b = nrm(ks[14], (1, d), 0.1)
        self.text_projection = nrm(ks[15], (d, embed_dim)).astype(mm_dtype)


def text_encoder_forward(p, prompts, tokenized_prompts, deep_prompts):
    """Pallas TextEncoder.forward(prompts, tokenized_prompts, deep_prompts)."""
    n_cls, seq, d = prompts.shape
    L = p.layers
    n_deep = int(deep_prompts.shape[0])

    # One class block for tiny n_cls; for large n_cls (multiple of 8) this could be a
    # smaller block so the "parallel" class axis shards across v7x TensorCores.
    cb = n_cls
    rows = cb * seq

    # ---- tiny wrapper-side prep (removes in-kernel argmax / concat / pad work) ----
    eot = jnp.argmax(tokenized_prompts, axis=-1).astype(jnp.int32)        # (n_cls,)
    flat_eot = jnp.arange(n_cls, dtype=jnp.int32) * seq + eot
    # Block-diagonal one-hot selection matrix: sel[c, c*seq + eot[c]] = 1.
    sel = (flat_eot[:, None] ==
           jnp.arange(n_cls * seq, dtype=jnp.int32)[None, :]).astype(jnp.float32)

    if n_deep > 0:
        deep_pad = jnp.pad(deep_prompts.astype(jnp.float32),
                           ((0, 0), (1, seq - 1 - p.n_ctx), (0, 0)))      # (n_deep, seq, d)
    else:
        deep_pad = jnp.zeros((1, seq, d), jnp.float32)
    n_deep_blocks = deep_pad.shape[0]

    kernel = functools.partial(_text_encoder_kernel,
                               n_heads=p.heads, n_ctx=p.n_ctx, n_deep=n_deep)

    def per_layer(shape_tail):
        return pl.BlockSpec((1,) + shape_tail, lambda ci, l: (l,) + (0,) * len(shape_tail))

    in_specs = [
        pl.BlockSpec((cb, seq, d), lambda ci, l: (ci, 0, 0)),              # prompts
        pl.BlockSpec((seq, d), lambda ci, l: (0, 0)),                      # positional emb
        pl.BlockSpec((1, seq, d),                                          # deep prompts
                     lambda ci, l: (jnp.minimum(jnp.maximum(l - 1, 0),
                                                n_deep_blocks - 1), 0, 0)),
        pl.BlockSpec((cb, cb * seq), lambda ci, l: (ci, ci)),              # EOT one-hot (block-diag)
        per_layer((1, d)),                                                 # ln1_w
        per_layer((1, d)),                                                 # ln1_b
        per_layer((d, 3 * d)),                                             # w_qkv
        per_layer((1, 3 * d)),                                             # b_qkv
        per_layer((d, d)),                                                 # w_o
        per_layer((1, d)),                                                 # b_o
        per_layer((1, d)),                                                 # ln2_w
        per_layer((1, d)),                                                 # ln2_b
        per_layer((d, 4 * d)),                                             # w_fc1
        per_layer((1, 4 * d)),                                             # b_fc1
        per_layer((4 * d, d)),                                             # w_fc2
        per_layer((1, d)),                                                 # b_fc2
        pl.BlockSpec((1, d), lambda ci, l: (0, 0)),                        # lnf_w
        pl.BlockSpec((1, d), lambda ci, l: (0, 0)),                        # lnf_b
        pl.BlockSpec((d, p.embed_dim), lambda ci, l: (0, 0)),              # text_projection
    ]
    out_spec = pl.BlockSpec((cb, p.embed_dim), lambda ci, l: (ci, 0))

    return pl.pallas_call(
        kernel,
        out_shape=jax.ShapeDtypeStruct((n_cls, p.embed_dim), prompts.dtype),
        grid=(n_cls // cb, L),
        in_specs=in_specs,
        out_specs=out_spec,
        scratch_shapes=[pltpu.VMEM((rows, d), jnp.float32)],               # activation carry
        compiler_params=pltpu.CompilerParams(
            dimension_semantics=("parallel", "arbitrary")),
    )(prompts, p.pos_emb, deep_pad, sel,
      p.ln1_w, p.ln1_b, p.w_qkv, p.b_qkv, p.w_o, p.b_o,
      p.ln2_w, p.ln2_b, p.w_fc1, p.b_fc1, p.w_fc2, p.b_fc2,
      p.lnf_w, p.lnf_b, p.text_projection)


# ----------------------------- pure-JAX reference ------------------------------------

def text_encoder_ref(p, prompts, tok, deep):
    d, H, hd = p.width, p.heads, p.width // p.heads
    n_cls, seq, _ = prompts.shape
    x = prompts + p.pos_emb[None]
    ri = jnp.arange(seq)[:, None]
    ci = jnp.arange(seq)[None, :]
    causal = jnp.where(ci <= ri, 0.0, -1e9).astype(jnp.float32)
    scale = 1.0 / math.sqrt(hd)
    for l in range(p.layers):
        if l >= 1 and (l - 1) < deep.shape[0]:
            dp = jnp.broadcast_to(deep[l - 1][None], (n_cls, p.n_ctx, d))
            x = jnp.concatenate([x[:, :1], dp, x[:, 1 + p.n_ctx:]], axis=1)
        x2 = x.reshape(n_cls * seq, d)
        h = _layernorm(x2, p.ln1_w[l], p.ln1_b[l])
        qkv = h @ p.w_qkv[l].astype(jnp.float32) + p.b_qkv[l]
        q, k, v = jnp.split(qkv, 3, axis=-1)
        q = q.reshape(n_cls, seq, H, hd)
        k = k.reshape(n_cls, seq, H, hd)
        v = v.reshape(n_cls, seq, H, hd)
        s = jnp.einsum('bqhd,bkhd->bhqk', q, k) * scale + causal
        m = jnp.max(s, axis=-1, keepdims=True)
        e = jnp.exp(s - m)
        pr = e / jnp.sum(e, axis=-1, keepdims=True)
        o = jnp.einsum('bhqk,bkhd->bqhd', pr, v).reshape(n_cls * seq, d)
        x2 = x2 + (o @ p.w_o[l].astype(jnp.float32) + p.b_o[l])
        h2 = _layernorm(x2, p.ln2_w[l], p.ln2_b[l])
        x2 = x2 + _quick_gelu_ref(h2 @ p.w_fc1[l].astype(jnp.float32)
                                  + p.b_fc1[l]) @ p.w_fc2[l].astype(jnp.float32) + p.b_fc2[l]
        x = x2.reshape(n_cls, seq, d)
    xf = _layernorm(x.reshape(n_cls * seq, d), p.lnf_w, p.lnf_b).reshape(n_cls, seq, d)
    eot = jnp.argmax(tok, axis=-1)
    return xf[jnp.arange(n_cls), eot] @ p.text_projection.astype(jnp.float32)


# ----------------------------- demo / self-check -------------------------------------

if __name__ == "__main__":
    key = jax.random.PRNGKey(0)
    kp, kx, kt, kd = jax.random.split(key, 4)

    params = TextEncoderParams(kp)
    n_cls, seq, d = params.n_cls, params.seq, params.width

    # Assembled text prompts from the prompt learner: (n_cls, seq, ctx_dim)
    prompts = (0.02 * jax.random.normal(kx, (n_cls, seq, d))).astype(jnp.float32)
    # Deep text prompts injected at blocks 1..: (layers-1, n_ctx, ctx_dim)
    deep_prompts = (0.02 * jax.random.normal(
        kd, (params.layers - 1, params.n_ctx, d))).astype(jnp.float32)
    # Tokenized prompts: small ids, with the EOT token (largest id) at a per-class
    # position so argmax(-1) picks the EOT slot.
    tok = jax.random.randint(kt, (n_cls, seq), 1, 400, dtype=jnp.int32)
    eot_pos = jnp.array([5, 7, 6, 4], dtype=jnp.int32)
    tok = tok.at[jnp.arange(n_cls), eot_pos].set(49407)

    out = text_encoder_forward(params, prompts, tok, deep_prompts)
    out = jax.block_until_ready(out)

    with jax.default_matmul_precision("highest"):
        ref = text_encoder_ref(params, prompts, tok, deep_prompts)

    assert out.shape == (n_cls, params.embed_dim)
    assert jnp.allclose(out, ref, atol=2e-2, rtol=2e-2), float(
        jnp.max(jnp.abs(out - ref)))
    print("KERNEL_OK")
</pallas_src>

<mosaic_0001>
module attributes {stable_mosaic.version = 11 : i64} {
  func.func @_text_encoder_kernel(%arg0: i32, %arg1: i32, %arg2: memref<4x8x32xf32, #tpu.memory_space<vmem>>, %arg3: memref<8x32xf32, #tpu.memory_space<vmem>>, %arg4: memref<1x8x32xf32, #tpu.memory_space<vmem>>, %arg5: memref<4x32xf32, #tpu.memory_space<vmem>>, %arg6: memref<1x1x32xf32, #tpu.memory_space<vmem>>, %arg7: memref<1x1x32xf32, #tpu.memory_space<vmem>>, %arg8: memref<1x32x96xbf16, #tpu.memory_space<vmem>>, %arg9: memref<1x1x96xf32, #tpu.memory_space<vmem>>, %arg10: memref<1x32x32xbf16, #tpu.memory_space<vmem>>, %arg11: memref<1x1x32xf32, #tpu.memory_space<vmem>>, %arg12: memref<1x1x32xf32, #tpu.memory_space<vmem>>, %arg13: memref<1x1x32xf32, #tpu.memory_space<vmem>>, %arg14: memref<1x32x128xbf16, #tpu.memory_space<vmem>>, %arg15: memref<1x1x128xf32, #tpu.memory_space<vmem>>, %arg16: memref<1x128x32xbf16, #tpu.memory_space<vmem>>, %arg17: memref<1x1x32xf32, #tpu.memory_space<vmem>>, %arg18: memref<1x32xf32, #tpu.memory_space<vmem>>, %arg19: memref<1x32xf32, #tpu.memory_space<vmem>>, %arg20: memref<32x128xbf16, #tpu.memory_space<vmem>>, %arg21: memref<4x128xf32, #tpu.memory_space<vmem>>, %arg22: memref<32x32xf32, #tpu.memory_space<vmem>>) attributes {dimension_semantics = [#tpu.dimension_semantics<parallel>, #tpu.dimension_semantics<arbitrary>], iteration_bounds = array<i64: 1, 2>, scalar_prefetch = 0 : i64, scratch_operands = 1 : i64, tpu.core_type = #tpu.core_type<tc>, window_params = [{transform_indices = @transform_0, window_bounds = array<i64: 4, 8, 32>}, {pipeline_mode = #tpu.pipeline_mode<synchronous>, transform_indices = @transform_1, window_bounds = array<i64: 8, 32>}, {transform_indices = @transform_2, window_bounds = array<i64: 1, 8, 32>}, {transform_indices = @transform_3, window_bounds = array<i64: 4, 32>}, {transform_indices = @transform_4, window_bounds = array<i64: 1, 1, 32>}, {transform_indices = @transform_5, window_bounds = array<i64: 1, 1, 32>}, {transform_indices = @transform_6, window_bounds = array<i64: 1, 32, 96>}, {transform_indices = @transform_7, window_bounds = array<i64: 1, 1, 96>}, {transform_indices = @transform_8, window_bounds = array<i64: 1, 32, 32>}, {transform_indices = @transform_9, window_bounds = array<i64: 1, 1, 32>}, {transform_indices = @transform_10, window_bounds = array<i64: 1, 1, 32>}, {transform_indices = @transform_11, window_bounds = array<i64: 1, 1, 32>}, {transform_indices = @transform_12, window_bounds = array<i64: 1, 32, 128>}, {transform_indices = @transform_13, window_bounds = array<i64: 1, 1, 128>}, {transform_indices = @transform_14, window_bounds = array<i64: 1, 128, 32>}, {transform_indices = @transform_15, window_bounds = array<i64: 1, 1, 32>}, {pipeline_mode = #tpu.pipeline_mode<synchronous>, transform_indices = @transform_16, window_bounds = array<i64: 1, 32>}, {pipeline_mode = #tpu.pipeline_mode<synchronous>, transform_indices = @transform_17, window_bounds = array<i64: 1, 32>}, {pipeline_mode = #tpu.pipeline_mode<synchronous>, transform_indices = @transform_18, window_bounds = array<i64: 32, 128>}, {transform_indices = @transform_19, window_bounds = array<i64: 4, 128>}]} {
    %c0_i32 = arith.constant 0 : i32
    %0 = arith.cmpi eq, %arg1, %c0_i32 : i32
    %1 = arith.extui %0 : i1 to i32
    %c0_i32_0 = arith.constant 0 : i32
    %2 = arith.cmpi ne, %1, %c0_i32_0 : i32
    scf.if %2 {
      %c0_81 = arith.constant 0 : index
      %c0_82 = arith.constant 0 : index
      %c0_83 = arith.constant 0 : index
      %209 = vector.load %arg2[%c0_81, %c0_82, %c0_83] : memref<4x8x32xf32, #tpu.memory_space<vmem>>, vector<4x8x32xf32>
      %c0_84 = arith.constant 0 : index
      %c0_85 = arith.constant 0 : index
      %210 = vector.load %arg3[%c0_84, %c0_85] : memref<8x32xf32, #tpu.memory_space<vmem>>, vector<8x32xf32>
      %211 = vector.shape_cast %210 : vector<8x32xf32> to vector<1x8x32xf32>
      %212 = vector.broadcast %211 : vector<1x8x32xf32> to vector<4x8x32xf32>
      %213 = arith.addf %209, %212 : vector<4x8x32xf32>
      %214 = vector.shape_cast %213 : vector<4x8x32xf32> to vector<32x32xf32>
      %c0_86 = arith.constant 0 : index
      %c0_87 = arith.constant 0 : index
      %215 = vector.load %arg22[%c0_86, %c0_87] : memref<32x32xf32, #tpu.memory_space<vmem>>, vector<32x32xf32>
      tpu.vector_store %arg22[%c0_86, %c0_87], %214 {strides = array<i32>} : memref<32x32xf32, #tpu.memory_space<vmem>>, vector<32x32xf32>,
    } else {
    }
    %c1_i32 = arith.constant 1 : i32
    %3 = arith.cmpi sge, %arg1, %c1_i32 : i32
    %c1_i32_1 = arith.constant 1 : i32
    %4 = arith.cmpi sle, %arg1, %c1_i32_1 : i32
    %5 = arith.andi %3, %4 : i1
    %6 = arith.extui %5 : i1 to i32
    %c0_i32_2 = arith.constant 0 : i32
    %7 = arith.cmpi ne, %6, %c0_i32_2 : i32
    scf.if %7 {
      %209 = tpu.iota {dimensions = array<i32: 1>} : vector<1x8x1xi32>
      %c1_i32_81 = arith.constant 1 : i32
      %210 = vector.broadcast %c1_i32_81 : i32 to vector<1x8x1xi32>
      %211 = arith.cmpi sge, %209, %210 : vector<1x8x1xi32>
      %c5_i32 = arith.constant 5 : i32
      %212 = vector.broadcast %c5_i32 : i32 to vector<1x8x1xi32>
      %213 = arith.cmpi slt, %209, %212 : vector<1x8x1xi32>
      %214 = arith.andi %211, %213 : vector<1x8x1xi1>
      %c0_82 = arith.constant 0 : index
      %c0_83 = arith.constant 0 : index
      %c0_84 = arith.constant 0 : index
      %215 = vector.load %arg4[%c0_82, %c0_83, %c0_84] : memref<1x8x32xf32, #tpu.memory_space<vmem>>, vector<1x8x32xf32>
      %c0_85 = arith.constant 0 : index
      %c0_86 = arith.constant 0 : index
      %216 = vector.load %arg22[%c0_85, %c0_86] : memref<32x32xf32, #tpu.memory_space<vmem>>, vector<32x32xf32>
      %217 = vector.shape_cast %216 : vector<32x32xf32> to vector<4x8x32xf32>
      %218 = vector.shape_cast %214 : vector<1x8x1xi1> to vector<1x8x1xi1>
      %219 = vector.broadcast %218 : vector<1x8x1xi1> to vector<4x8x32xi1>
      %220 = vector.shape_cast %215 : vector<1x8x32xf32> to vector<1x8x32xf32>
      %221 = vector.broadcast %220 : vector<1x8x32xf32> to vector<4x8x32xf32>
      %222 = arith.select %219, %221, %217 : vector<4x8x32xi1>, vector<4x8x32xf32>
      %223 = vector.shape_cast %222 : vector<4x8x32xf32> to vector<32x32xf32>
      %c0_87 = arith.constant 0 : index
      %c0_88 = arith.constant 0 : index
      %224 = vector.load %arg22[%c0_87, %c0_88] : memref<32x32xf32, #tpu.memory_space<vmem>>, vector<32x32xf32>
      tpu.vector_store %arg22[%c0_87, %c0_88], %223 {strides = array<i32>} : memref<32x32xf32, #tpu.memory_space<vmem>>, vector<32x32xf32>,
    } else {
    }
    %c0 = arith.constant 0 : index
    %c0_3 = arith.constant 0 : index
    %8 = vector.load %arg22[%c0, %c0_3] : memref<32x32xf32, #tpu.memory_space<vmem>>, vector<32x32xf32>
    %c0_4 = arith.constant 0 : index
    %c0_5 = arith.constant 0 : index
    %c0_6 = arith.constant 0 : index
    %9 = vector.load %arg6[%c0_4, %c0_5, %c0_6] : memref<1x1x32xf32, #tpu.memory_space<vmem>>, vector<1x1x32xf32>
    %10 = vector.shape_cast %9 : vector<1x1x32xf32> to vector<1x32xf32>
    %c0_7 = arith.constant 0 : index
    %c0_8 = arith.constant 0 : index
    %c0_9 = arith.constant 0 : index
    %11 = vector.load %arg7[%c0_7, %c0_8, %c0_9] : memref<1x1x32xf32, #tpu.memory_space<vmem>>, vector<1x1x32xf32>
    %12 = vector.shape_cast %11 : vector<1x1x32xf32> to vector<1x32xf32>
    %cst = arith.constant dense<0.000000e+00> : vector<32xf32>
    %13 = vector.multi_reduction <add>, %8, %cst [1] : vector<32x32xf32> to vector<32xf32>
    %14 = vector.shape_cast %13 : vector<32xf32> to vector<32x1xf32>
    %cst_10 = arith.constant 3.200000e+01 : f32
    %15 = vector.broadcast %cst_10 : f32 to vector<32x1xf32>
    %16 = arith.divf %14, %15 : vector<32x1xf32>
    %17 = vector.broadcast %16 : vector<32x1xf32> to vector<32x32xf32>
    %18 = arith.subf %8, %17 : vector<32x32xf32>
    %19 = arith.mulf %18, %18 : vector<32x32xf32>
    %cst_11 = arith.constant dense<0.000000e+00> : vector<32xf32>
    %20 = vector.multi_reduction <add>, %19, %cst_11 [1] : vector<32x32xf32> to vector<32xf32>
    %21 = vector.shape_cast %20 : vector<32xf32> to vector<32x1xf32>
    %cst_12 = arith.constant 3.200000e+01 : f32
    %22 = vector.broadcast %cst_12 : f32 to vector<32x1xf32>
    %23 = arith.divf %21, %22 : vector<32x1xf32>
    %cst_13 = arith.constant 9.99999974E-6 : f32
    %24 = vector.broadcast %cst_13 : f32 to vector<32x1xf32>
    %25 = arith.addf %23, %24 : vector<32x1xf32>
    %26 = math.rsqrt %25 : vector<32x1xf32>
    %27 = vector.broadcast %26 : vector<32x1xf32> to vector<32x32xf32>
    %28 = arith.mulf %18, %27 : vector<32x32xf32>
    %29 = vector.broadcast %10 : vector<1x32xf32> to vector<32x32xf32>
    %30 = arith.mulf %28, %29 : vector<32x32xf32>
    %31 = vector.broadcast %12 : vector<1x32xf32> to vector<32x32xf32>
    %32 = arith.addf %30, %31 : vector<32x32xf32>
    %33 = arith.truncf %32 : vector<32x32xf32> to vector<32x32xbf16>
    %c0_14 = arith.constant 0 : index
    %c0_15 = arith.constant 0 : index
    %c0_16 = arith.constant 0 : index
    %34 = vector.load %arg8[%c0_14, %c0_15, %c0_16] : memref<1x32x96xbf16, #tpu.memory_space<vmem>>, vector<1x32x96xbf16>
    %35 = vector.shape_cast %34 : vector<1x32x96xbf16> to vector<32x96xbf16>
    %cst_17 = arith.constant dense<0.000000e+00> : vector<32x96xf32>
    %36 = tpu.matmul %33, %35, %cst_17 {dimension_numbers = #tpu.dot_dimension_numbers<[1], [0], [0], [1], [0, 0, 1, 1], [], []>} : vector<32x32xbf16>, vector<32x96xbf16>, vector<32x96xf32> -> vector<32x96xf32>
    %c0_18 = arith.constant 0 : index
    %c0_19 = arith.constant 0 : index
    %c0_20 = arith.constant 0 : index
    %37 = vector.load %arg9[%c0_18, %c0_19, %c0_20] : memref<1x1x96xf32, #tpu.memory_space<vmem>>, vector<1x1x96xf32>
    %38 = vector.shape_cast %37 : vector<1x1x96xf32> to vector<1x96xf32>
    %39 = vector.broadcast %38 : vector<1x96xf32> to vector<32x96xf32>
    %40 = arith.addf %36, %39 : vector<32x96xf32>
    %41 = vector.extract_strided_slice %40 {offsets = [0, 0], sizes = [32, 32], strides = [1, 1]} : vector<32x96xf32> to vector<32x32xf32>
    %42 = vector.shape_cast %41 : vector<32x32xf32> to vector<4x8x32xf32>
    %43 = vector.extract_strided_slice %40 {offsets = [0, 32], sizes = [32, 32], strides = [1, 1]} : vector<32x96xf32> to vector<32x32xf32>
    %44 = vector.shape_cast %43 : vector<32x32xf32> to vector<4x8x32xf32>
    %45 = vector.extract_strided_slice %40 {offsets = [0, 64], sizes = [32, 32], strides = [1, 1]} : vector<32x96xf32> to vector<32x32xf32>
    %46 = vector.shape_cast %45 : vector<32x32xf32> to vector<4x8x32xf32>
    %47 = tpu.iota {dimensions = array<i32: 0>} : vector<8x8xi32>
    %48 = tpu.iota {dimensions = array<i32: 1>} : vector<8x8xi32>
    %49 = arith.cmpi sle, %48, %47 : vector<8x8xi32>
    %cst_21 = arith.constant 0.000000e+00 : f32
    %cst_22 = arith.constant -1.000000e+09 : f32
    %50 = vector.broadcast %cst_21 : f32 to vector<8x8xf32>
    %51 = vector.broadcast %cst_22 : f32 to vector<8x8xf32>
    %52 = arith.select %49, %50, %51 : vector<8x8xi1>, vector<8x8xf32>
    %53 = vector.shape_cast %52 : vector<8x8xf32> to vector<1x8x8xf32>
    %54 = vector.extract_strided_slice %42 {offsets = [0, 0, 0], sizes = [4, 8, 8], strides = [1, 1, 1]} : vector<4x8x32xf32> to vector<4x8x8xf32>
    %55 = arith.truncf %54 : vector<4x8x8xf32> to vector<4x8x8xbf16>
    %56 = vector.extract_strided_slice %44 {offsets = [0, 0, 0], sizes = [4, 8, 8], strides = [1, 1, 1]} : vector<4x8x32xf32> to vector<4x8x8xf32>
    %57 = arith.truncf %56 : vector<4x8x8xf32> to vector<4x8x8xbf16>
    %58 = vector.extract_strided_slice %46 {offsets = [0, 0, 0], sizes = [4, 8, 8], strides = [1, 1, 1]} : vector<4x8x32xf32> to vector<4x8x8xf32>
    %59 = arith.truncf %58 : vector<4x8x8xf32> to vector<4x8x8xbf16>
    %cst_23 = arith.constant dense<0.000000e+00> : vector<4x8x8xf32>
    %60 = tpu.matmul %55, %57, %cst_23 {dimension_numbers = #tpu.dot_dimension_numbers<[2], [2], [1], [1], [0, 0, 0, 1, 1, 1], [0], [0]>} : vector<4x8x8xbf16>, vector<4x8x8xbf16>, vector<4x8x8xf32> -> vector<4x8x8xf32>
    %cst_24 = arith.constant 0.353553385 : f32
    %61 = vector.broadcast %cst_24 : f32 to vector<4x8x8xf32>
    %62 = arith.mulf %60, %61 : vector<4x8x8xf32>
    %63 = vector.broadcast %53 : vector<1x8x8xf32> to vector<4x8x8xf32>
    %64 = arith.addf %62, %63 : vector<4x8x8xf32>
    %cst_25 = arith.constant dense<0xFF800000> : vector<4x8xf32>
    %65 = vector.multi_reduction <maximumf>, %64, %cst_25 [2] : vector<4x8x8xf32> to vector<4x8xf32>
    %66 = vector.shape_cast %65 : vector<4x8xf32> to vector<4x8x1xf32>
    %67 = vector.broadcast %66 : vector<4x8x1xf32> to vector<4x8x8xf32>
    %68 = arith.subf %64, %67 : vector<4x8x8xf32>
    %69 = math.exp %68 : vector<4x8x8xf32>
    %cst_26 = arith.constant dense<0.000000e+00> : vector<4x8xf32>
    %70 = vector.multi_reduction <add>, %69, %cst_26 [2] : vector<4x8x8xf32> to vector<4x8xf32>
    %71 = vector.shape_cast %70 : vector<4x8xf32> to vector<4x8x1xf32>
    %72 = tpu.reciprocal %71 {approx = true} : vector<4x8x1xf32> -> vector<4x8x1xf32>
    %73 = vector.broadcast %72 : vector<4x8x1xf32> to vector<4x8x8xf32>
    %74 = arith.mulf %69, %73 : vector<4x8x8xf32>
    %75 = arith.truncf %74 : vector<4x8x8xf32> to vector<4x8x8xbf16>
    %cst_27 = arith.constant dense<0.000000e+00> : vector<4x8x8xf32>
    %76 = tpu.matmul %75, %59, %cst_27 {dimension_numbers = #tpu.dot_dimension_numbers<[2], [1], [1], [2], [0, 0, 0, 1, 1, 2], [0], [0]>} : vector<4x8x8xbf16>, vector<4x8x8xbf16>, vector<4x8x8xf32> -> vector<4x8x8xf32>
    %77 = vector.extract_strided_slice %42 {offsets = [0, 0, 8], sizes = [4, 8, 8], strides = [1, 1, 1]} : vector<4x8x32xf32> to vector<4x8x8xf32>
    %78 = arith.truncf %77 : vector<4x8x8xf32> to vector<4x8x8xbf16>
    %79 = vector.extract_strided_slice %44 {offsets = [0, 0, 8], sizes = [4, 8, 8], strides = [1, 1, 1]} : vector<4x8x32xf32> to vector<4x8x8xf32>
    %80 = arith.truncf %79 : vector<4x8x8xf32> to vector<4x8x8xbf16>
    %81 = vector.extract_strided_slice %46 {offsets = [0, 0, 8], sizes = [4, 8, 8], strides = [1, 1, 1]} : vector<4x8x32xf32> to vector<4x8x8xf32>
    %82 = arith.truncf %81 : vector<4x8x8xf32> to vector<4x8x8xbf16>
    %cst_28 = arith.constant dense<0.000000e+00> : vector<4x8x8xf32>
    %83 = tpu.matmul %78, %80, %cst_28 {dimension_numbers = #tpu.dot_dimension_numbers<[2], [2], [1], [1], [0, 0, 0, 1, 1, 1], [0], [0]>} : vector<4x8x8xbf16>, vector<4x8x8xbf16>, vector<4x8x8xf32> -> vector<4x8x8xf32>
    %cst_29 = arith.constant 0.353553385 : f32
    %84 = vector.broadcast %cst_29 : f32 to vector<4x8x8xf32>
    %85 = arith.mulf %83, %84 : vector<4x8x8xf32>
    %86 = vector.broadcast %53 : vector<1x8x8xf32> to vector<4x8x8xf32>
    %87 = arith.addf %85, %86 : vector<4x8x8xf32>
    %cst_30 = arith.constant dense<0xFF800000> : vector<4x8xf32>
    %88 = vector.multi_reduction <maximumf>, %87, %cst_30 [2] : vector<4x8x8xf32> to vector<4x8xf32>
    %89 = vector.shape_cast %88 : vector<4x8xf32> to vector<4x8x1xf32>
    %90 = vector.broadcast %89 : vector<4x8x1xf32> to vector<4x8x8xf32>
    %91 = arith.subf %87, %90 : vector<4x8x8xf32>
    %92 = math.exp %91 : vector<4x8x8xf32>
    %cst_31 = arith.constant dense<0.000000e+00> : vector<4x8xf32>
    %93 = vector.multi_reduction <add>, %92, %cst_31 [2] : vector<4x8x8xf32> to vector<4x8xf32>
    %94 = vector.shape_cast %93 : vector<4x8xf32> to vector<4x8x1xf32>
    %95 = tpu.reciprocal %94 {approx = true} : vector<4x8x1xf32> -> vector<4x8x1xf32>
    %96 = vector.broadcast %95 : vector<4x8x1xf32> to vector<4x8x8xf32>
    %97 = arith.mulf %92, %96 : vector<4x8x8xf32>
    %98 = arith.truncf %97 : vector<4x8x8xf32> to vector<4x8x8xbf16>
    %cst_32 = arith.constant dense<0.000000e+00> : vector<4x8x8xf32>
    %99 = tpu.matmul %98, %82, %cst_32 {dimension_numbers = #tpu.dot_dimension_numbers<[2], [1], [1], [2], [0, 0, 0, 1, 1, 2], [0], [0]>} : vector<4x8x8xbf16>, vector<4x8x8xbf16>, vector<4x8x8xf32> -> vector<4x8x8xf32>
    %100 = vector.extract_strided_slice %42 {offsets = [0, 0, 16], sizes = [4, 8, 8], strides = [1, 1, 1]} : vector<4x8x32xf32> to vector<4x8x8xf32>
    %101 = arith.truncf %100 : vector<4x8x8xf32> to vector<4x8x8xbf16>
    %102 = vector.extract_strided_slice %44 {offsets = [0, 0, 16], sizes = [4, 8, 8], strides = [1, 1, 1]} : vector<4x8x32xf32> to vector<4x8x8xf32>
    %103 = arith.truncf %102 : vector<4x8x8xf32> to vector<4x8x8xbf16>
    %104 = vector.extract_strided_slice %46 {offsets = [0, 0, 16], sizes = [4, 8, 8], strides = [1, 1, 1]} : vector<4x8x32xf32> to vector<4x8x8xf32>
    %105 = arith.truncf %104 : vector<4x8x8xf32> to vector<4x8x8xbf16>
    %cst_33 = arith.constant dense<0.000000e+00> : vector<4x8x8xf32>
    %106 = tpu.matmul %101, %103, %cst_33 {dimension_numbers = #tpu.dot_dimension_numbers<[2], [2], [1], [1], [0, 0, 0, 1, 1, 1], [0], [0]>} : vector<4x8x8xbf16>, vector<4x8x8xbf16>, vector<4x8x8xf32> -> vector<4x8x8xf32>
    %cst_34 = arith.constant 0.353553385 : f32
    %107 = vector.broadcast %cst_34 : f32 to vector<4x8x8xf32>
    %108 = arith.mulf %106, %107 : vector<4x8x8xf32>
    %109 = vector.broadcast %53 : vector<1x8x8xf32> to vector<4x8x8xf32>
    %110 = arith.addf %108, %109 : vector<4x8x8xf32>
    %cst_35 = arith.constant dense<0xFF800000> : vector<4x8xf32>
    %111 = vector.multi_reduction <maximumf>, %110, %cst_35 [2] : vector<4x8x8xf32> to vector<4x8xf32>
    %112 = vector.shape_cast %111 : vector<4x8xf32> to vector<4x8x1xf32>
    %113 = vector.broadcast %112 : vector<4x8x1xf32> to vector<4x8x8xf32>
    %114 = arith.subf %110, %113 : vector<4x8x8xf32>
    %115 = math.exp %114 : vector<4x8x8xf32>
    %cst_36 = arith.constant dense<0.000000e+00> : vector<4x8xf32>
    %116 = vector.multi_reduction <add>, %115, %cst_36 [2] : vector<4x8x8xf32> to vector<4x8xf32>
    %117 = vector.shape_cast %116 : vector<4x8xf32> to vector<4x8x1xf32>
    %118 = tpu.reciprocal %117 {approx = true} : vector<4x8x1xf32> -> vector<4x8x1xf32>
    %119 = vector.broadcast %118 : vector<4x8x1xf32> to vector<4x8x8xf32>
    %120 = arith.mulf %115, %119 : vector<4x8x8xf32>
    %121 = arith.truncf %120 : vector<4x8x8xf32> to vector<4x8x8xbf16>
    %cst_37 = arith.constant dense<0.000000e+00> : vector<4x8x8xf32>
    %122 = tpu.matmul %121, %105, %cst_37 {dimension_numbers = #tpu.dot_dimension_numbers<[2], [1], [1], [2], [0, 0, 0, 1, 1, 2], [0], [0]>} : vector<4x8x8xbf16>, vector<4x8x8xbf16>, vector<4x8x8xf32> -> vector<4x8x8xf32>
    %123 = vector.extract_strided_slice %42 {offsets = [0, 0, 24], sizes = [4, 8, 8], strides = [1, 1, 1]} : vector<4x8x32xf32> to vector<4x8x8xf32>
    %124 = arith.truncf %123 : vector<4x8x8xf32> to vector<4x8x8xbf16>
    %125 = vector.extract_strided_slice %44 {offsets = [0, 0, 24], sizes = [4, 8, 8], strides = [1, 1, 1]} : vector<4x8x32xf32> to vector<4x8x8xf32>
    %126 = arith.truncf %125 : vector<4x8x8xf32> to vector<4x8x8xbf16>
    %127 = vector.extract_strided_slice %46 {offsets = [0, 0, 24], sizes = [4, 8, 8], strides = [1, 1, 1]} : vector<4x8x32xf32> to vector<4x8x8xf32>
    %128 = arith.truncf %127 : vector<4x8x8xf32> to vector<4x8x8xbf16>
    %cst_38 = arith.constant dense<0.000000e+00> : vector<4x8x8xf32>
    %129 = tpu.matmul %124, %126, %cst_38 {dimension_numbers = #tpu.dot_dimension_numbers<[2], [2], [1], [1], [0, 0, 0, 1, 1, 1], [0], [0]>} : vector<4x8x8xbf16>, vector<4x8x8xbf16>, vector<4x8x8xf32> -> vector<4x8x8xf32>
    %cst_39 = arith.constant 0.353553385 : f32
    %130 = vector.broadcast %cst_39 : f32 to vector<4x8x8xf32>
    %131 = arith.mulf %129, %130 : vector<4x8x8xf32>
    %132 = vector.broadcast %53 : vector<1x8x8xf32> to vector<4x8x8xf32>
    %133 = arith.addf %131, %132 : vector<4x8x8xf32>
    %cst_40 = arith.constant dense<0xFF800000> : vector<4x8xf32>
    %134 = vector.multi_reduction <maximumf>, %133, %cst_40 [2] : vector<4x8x8xf32> to vector<4x8xf32>
    %135 = vector.shape_cast %134 : vector<4x8xf32> to vector<4x8x1xf32>
    %136 = vector.broadcast %135 : vector<4x8x1xf32> to vector<4x8x8xf32>
    %137 = arith.subf %133, %136 : vector<4x8x8xf32>
    %138 = math.exp %137 : vector<4x8x8xf32>
    %cst_41 = arith.constant dense<0.000000e+00> : vector<4x8xf32>
    %139 = vector.multi_reduction <add>, %138, %cst_41 [2] : vector<4x8x8xf32> to vector<4x8xf32>
    %140 = vector.shape_cast %139 : vector<4x8xf32> to vector<4x8x1xf32>
    %141 = tpu.reciprocal %140 {approx = true} : vector<4x8x1xf32> -> vector<4x8x1xf32>
    %142 = vector.broadcast %141 : vector<4x8x1xf32> to vector<4x8x8xf32>
    %143 = arith.mulf %138, %142 : vector<4x8x8xf32>
    %144 = arith.truncf %143 : vector<4x8x8xf32> to vector<4x8x8xbf16>
    %cst_42 = arith.constant dense<0.000000e+00> : vector<4x8x8xf32>
    %145 = tpu.matmul %144, %128, %cst_42 {dimension_numbers = #tpu.dot_dimension_numbers<[2], [1], [1], [2], [0, 0, 0, 1, 1, 2], [0], [0]>} : vector<4x8x8xbf16>, vector<4x8x8xbf16>, vector<4x8x8xf32> -> vector<4x8x8xf32>
    %146 = tpu.concatenate %76, %99, %122, %145 in 2 : vector<4x8x8xf32>, vector<4x8x8xf32>, vector<4x8x8xf32>, vector<4x8x8xf32> -> vector<4x8x32xf32>
    %147 = vector.shape_cast %146 : vector<4x8x32xf32> to vector<32x32xf32>
    %148 = arith.truncf %147 : vector<32x32xf32> to vector<32x32xbf16>
    %c0_43 = arith.constant 0 : index
    %c0_44 = arith.constant 0 : index
    %c0_45 = arith.constant 0 : index
    %149 = vector.load %arg10[%c0_43, %c0_44, %c0_45] : memref<1x32x32xbf16, #tpu.memory_space<vmem>>, vector<1x32x32xbf16>
    %150 = vector.shape_cast %149 : vector<1x32x32xbf16> to vector<32x32xbf16>
    %cst_46 = arith.constant dense<0.000000e+00> : vector<32x32xf32>
    %151 = tpu.matmul %148, %150, %cst_46 {dimension_numbers = #tpu.dot_dimension_numbers<[1], [0], [0], [1], [0, 0, 1, 1], [], []>} : vector<32x32xbf16>, vector<32x32xbf16>, vector<32x32xf32> -> vector<32x32xf32>
    %c0_47 = arith.constant 0 : index
    %c0_48 = arith.constant 0 : index
    %c0_49 = arith.constant 0 : index
    %152 = vector.load %arg11[%c0_47, %c0_48, %c0_49] : memref<1x1x32xf32, #tpu.memory_space<vmem>>, vector<1x1x32xf32>
    %153 = vector.shape_cast %152 : vector<1x1x32xf32> to vector<1x32xf32>
    %154 = vector.broadcast %153 : vector<1x32xf32> to vector<32x32xf32>
    %155 = arith.addf %151, %154 : vector<32x32xf32>
    %156 = arith.addf %8, %155 : vector<32x32xf32>
    %c0_50 = arith.constant 0 : index
    %c0_51 = arith.constant 0 : index
    %c0_52 = arith.constant 0 : index
    %157 = vector.load %arg12[%c0_50, %c0_51, %c0_52] : memref<1x1x32xf32, #tpu.memory_space<vmem>>, vector<1x1x32xf32>
    %158 = vector.shape_cast %157 : vector<1x1x32xf32> to vector<1x32xf32>
    %c0_53 = arith.constant 0 : index
    %c0_54 = arith.constant 0 : index
    %c0_55 = arith.constant 0 : index
    %159 = vector.load %arg13[%c0_53, %c0_54, %c0_55] : memref<1x1x32xf32, #tpu.memory_space<vmem>>, vector<1x1x32xf32>
    %160 = vector.shape_cast %159 : vector<1x1x32xf32> to vector<1x32xf32>
    %cst_56 = arith.constant dense<0.000000e+00> : vector<32xf32>
    %161 = vector.multi_reduction <add>, %156, %cst_56 [1] : vector<32x32xf32> to vector<32xf32>
    %162 = vector.shape_cast %161 : vector<32xf32> to vector<32x1xf32>
    %cst_57 = arith.constant 3.200000e+01 : f32
    %163 = vector.broadcast %cst_57 : f32 to vector<32x1xf32>
    %164 = arith.divf %162, %163 : vector<32x1xf32>
    %165 = vector.broadcast %164 : vector<32x1xf32> to vector<32x32xf32>
    %166 = arith.subf %156, %165 : vector<32x32xf32>
    %167 = arith.mulf %166, %166 : vector<32x32xf32>
    %cst_58 = arith.constant dense<0.000000e+00> : vector<32xf32>
    %168 = vector.multi_reduction <add>, %167, %cst_58 [1] : vector<32x32xf32> to vector<32xf32>
    %169 = vector.shape_cast %168 : vector<32xf32> to vector<32x1xf32>
    %cst_59 = arith.constant 3.200000e+01 : f32
    %170 = vector.broadcast %cst_59 : f32 to vector<32x1xf32>
    %171 = arith.divf %169, %170 : vector<32x1xf32>
    %cst_60 = arith.constant 9.99999974E-6 : f32
    %172 = vector.broadcast %cst_60 : f32 to vector<32x1xf32>
    %173 = arith.addf %171, %172 : vector<32x1xf32>
    %174 = math.rsqrt %173 : vector<32x1xf32>
    %175 = vector.broadcast %174 : vector<32x1xf32> to vector<32x32xf32>
    %176 = arith.mulf %166, %175 : vector<32x32xf32>
    %177 = vector.broadcast %158 : vector<1x32xf32> to vector<32x32xf32>
    %178 = arith.mulf %176, %177 : vector<32x32xf32>
    %179 = vector.broadcast %160 : vector<1x32xf32> to vector<32x32xf32>
    %180 = arith.addf %178, %179 : vector<32x32xf32>
    %181 = arith.truncf %180 : vector<32x32xf32> to vector<32x32xbf16>
    %c0_61 = arith.constant 0 : index
    %c0_62 = arith.constant 0 : index
    %c0_63 = arith.constant 0 : index
    %182 = vector.load %arg14[%c0_61, %c0_62, %c0_63] : memref<1x32x128xbf16, #tpu.memory_space<vmem>>, vector<1x32x128xbf16>
    %183 = vector.shape_cast %182 : vector<1x32x128xbf16> to vector<32x128xbf16>
    %cst_64 = arith.constant dense<0.000000e+00> : vector<32x128xf32>
    %184 = tpu.matmul %181, %183, %cst_64 {dimension_numbers = #tpu.dot_dimension_numbers<[1], [0], [0], [1], [0, 0, 1, 1], [], []>} : vector<32x32xbf16>, vector<32x128xbf16>, vector<32x128xf32> -> vector<32x128xf32>
    %c0_65 = arith.constant 0 : index
    %c0_66 = arith.constant 0 : index
    %c0_67 = arith.constant 0 : index
    %185 = vector.load %arg15[%c0_65, %c0_66, %c0_67] : memref<1x1x128xf32, #tpu.memory_space<vmem>>, vector<1x1x128xf32>
    %186 = vector.shape_cast %185 : vector<1x1x128xf32> to vector<1x128xf32>
    %187 = vector.broadcast %186 : vector<1x128xf32> to vector<32x128xf32>
    %188 = arith.addf %184, %187 : vector<32x128xf32>
    %cst_68 = arith.constant -1.702000e+00 : f32
    %189 = vector.broadcast %cst_68 : f32 to vector<32x128xf32>
    %190 = arith.mulf %189, %188 : vector<32x128xf32>
    %191 = math.exp %190 : vector<32x128xf32>
    %cst_69 = arith.constant 1.000000e+00 : f32
    %192 = vector.broadcast %cst_69 : f32 to vector<32x128xf32>
    %193 = arith.addf %192, %191 : vector<32x128xf32>
    %194 = tpu.reciprocal %193 {approx = true} : vector<32x128xf32> -> vector<32x128xf32>
    %195 = arith.mulf %188, %194 : vector<32x128xf32>
    %196 = arith.truncf %195 : vector<32x128xf32> to vector<32x128xbf16>
    %c0_70 = arith.constant 0 : index
    %c0_71 = arith.constant 0 : index
    %c0_72 = arith.constant 0 : index
    %197 = vector.load %arg16[%c0_70, %c0_71, %c0_72] : memref<1x128x32xbf16, #tpu.memory_space<vmem>>, vector<1x128x32xbf16>
    %198 = vector.shape_cast %197 : vector<1x128x32xbf16> to vector<128x32xbf16>
    %cst_73 = arith.constant dense<0.000000e+00> : vector<32x32xf32>
    %199 = tpu.matmul %196, %198, %cst_73 {dimension_numbers = #tpu.dot_dimension_numbers<[1], [0], [0], [1], [0, 0, 1, 1], [], []>} : vector<32x128xbf16>, vector<128x32xbf16>, vector<32x32xf32> -> vector<32x32xf32>
    %200 = arith.addf %156, %199 : vector<32x32xf32>
    %c0_74 = arith.constant 0 : index
    %c0_75 = arith.constant 0 : index
    %c0_76 = arith.constant 0 : index
    %201 = vector.load %arg17[%c0_74, %c0_75, %c0_76] : memref<1x1x32xf32, #tpu.memory_space<vmem>>, vector<1x1x32xf32>
    %202 = vector.shape_cast %201 : vector<1x1x32xf32> to vector<1x32xf32>
    %203 = vector.broadcast %202 : vector<1x32xf32> to vector<32x32xf32>
    %204 = arith.addf %200, %203 : vector<32x32xf32>
    %c0_77 = arith.constant 0 : index
    %c0_78 = arith.constant 0 : index
    %205 = vector.load %arg22[%c0_77, %c0_78] : memref<32x32xf32, #tpu.memory_space<vmem>>, vector<32x32xf32>
    tpu.vector_store %arg22[%c0_77, %c0_78], %204 {strides = array<i32>} : memref<32x32xf32, #tpu.memory_space<vmem>>, vector<32x32xf32>,
    %c1_i32_79 = arith.constant 1 : i32
    %206 = arith.cmpi eq, %arg1, %c1_i32_79 : i32
    %207 = arith.extui %206 : i1 to i32
    %c0_i32_80 = arith.constant 0 : i32
    %208 = arith.cmpi ne, %207, %c0_i32_80 : i32
    scf.if %208 {
      %c0_81 = arith.constant 0 : index
      %c0_82 = arith.constant 0 : index
      %209 = vector.load %arg18[%c0_81, %c0_82] : memref<1x32xf32, #tpu.memory_space<vmem>>, vector<1x32xf32>
      %c0_83 = arith.constant 0 : index
      %c0_84 = arith.constant 0 : index
      %210 = vector.load %arg19[%c0_83, %c0_84] : memref<1x32xf32, #tpu.memory_space<vmem>>, vector<1x32xf32>
      %cst_85 = arith.constant dense<0.000000e+00> : vector<32xf32>
      %211 = vector.multi_reduction <add>, %204, %cst_85 [1] : vector<32x32xf32> to vector<32xf32>
      %212 = vector.shape_cast %211 : vector<32xf32> to vector<32x1xf32>
      %cst_86 = arith.constant 3.200000e+01 : f32
      %213 = vector.broadcast %cst_86 : f32 to vector<32x1xf32>
      %214 = arith.divf %212, %213 : vector<32x1xf32>
      %215 = vector.broadcast %214 : vector<32x1xf32> to vector<32x32xf32>
      %216 = arith.subf %204, %215 : vector<32x32xf32>
      %217 = arith.mulf %216, %216 : vector<32x32xf32>
      %cst_87 = arith.constant dense<0.000000e+00> : vector<32xf32>
      %218 = vector.multi_reduction <add>, %217, %cst_87 [1] : vector<32x32xf32> to vector<32xf32>
      %219 = vector.shape_cast %218 : vector<32xf32> to vector<32x1xf32>
      %cst_88 = arith.constant 3.200000e+01 : f32
      %220 = vector.broadcast %cst_88 : f32 to vector<32x1xf32>
      %221 = arith.divf %219, %220 : vector<32x1xf32>
      %cst_89 = arith.constant 9.99999974E-6 : f32
      %222 = vector.broadcast %cst_89 : f32 to vector<32x1xf32>
      %223 = arith.addf %221, %222 : vector<32x1xf32>
      %224 = math.rsqrt %223 : vector<32x1xf32>
      %225 = vector.broadcast %224 : vector<32x1xf32> to vector<32x32xf32>
      %226 = arith.mulf %216, %225 : vector<32x32xf32>
      %227 = vector.broadcast %209 : vector<1x32xf32> to vector<32x32xf32>
      %228 = arith.mulf %226, %227 : vector<32x32xf32>
      %229 = vector.broadcast %210 : vector<1x32xf32> to vector<32x32xf32>
      %230 = arith.addf %228, %229 : vector<32x32xf32>
      %c0_90 = arith.constant 0 : index
      %c0_91 = arith.constant 0 : index
      %231 = vector.load %arg5[%c0_90, %c0_91] : memref<4x32xf32, #tpu.memory_space<vmem>>, vector<4x32xf32>
      %cst_92 = arith.constant dense<0.000000e+00> : vector<4x32xf32>
      %232 = tpu.matmul %231, %230, %cst_92 {dimension_numbers = #tpu.dot_dimension_numbers<[1], [0], [0], [1], [0, 0, 1, 1], [], []>} : vector<4x32xf32>, vector<32x32xf32>, vector<4x32xf32> -> vector<4x32xf32>
      %233 = arith.truncf %232 : vector<4x32xf32> to vector<4x32xbf16>
      %c0_93 = arith.constant 0 : index
      %c0_94 = arith.constant 0 : index
      %234 = vector.load %arg20[%c0_93, %c0_94] : memref<32x128xbf16, #tpu.memory_space<vmem>>, vector<32x128xbf16>
      %cst_95 = arith.constant dense<0.000000e+00> : vector<4x128xf32>
      %235 = tpu.matmul %233, %234, %cst_95 {dimension_numbers = #tpu.dot_dimension_numbers<[1], [0], [0], [1], [0, 0, 1, 1], [], []>} : vector<4x32xbf16>, vector<32x128xbf16>, vector<4x128xf32> -> vector<4x128xf32>
      %c0_96 = arith.constant 0 : index
      %c0_97 = arith.constant 0 : index
      %236 = vector.load %arg21[%c0_96, %c0_97] : memref<4x128xf32, #tpu.memory_space<vmem>>, vector<4x128xf32>
      tpu.vector_store %arg21[%c0_96, %c0_97], %235 {strides = array<i32>} : memref<4x128xf32, #tpu.memory_space<vmem>>, vector<4x128xf32>,
    } else {
    }
    return
  }
  func.func @transform_0(%arg0: i32, %arg1: i32) -> (i32, i32, i32) {
    %c0_i32 = arith.constant 0 : i32
    %c0_i32_0 = arith.constant 0 : i32
    %c0_i32_1 = arith.constant 0 : i32
    return %arg0, %c0_i32, %c0_i32_0 : i32, i32, i32
  }
  func.func @transform_1(%arg0: i32, %arg1: i32) -> (i32, i32) {
    %c0_i32 = arith.constant 0 : i32
    %c0_i32_0 = arith.constant 0 : i32
    %c0_i32_1 = arith.constant 0 : i32
    return %c0_i32, %c0_i32_0 : i32, i32
  }
  func.func @transform_2(%arg0: i32, %arg1: i32) -> (i32, i32, i32) {
    %c1_i32 = arith.constant 1 : i32
    %0 = arith.subi %arg1, %c1_i32 : i32
    %c0_i32 = arith.constant 0 : i32
    %1 = arith.maxsi %0, %c0_i32 : i32
    %c0_i32_0 = arith.constant 0 : i32
    %2 = arith.minsi %1, %c0_i32_0 : i32
    %c0_i32_1 = arith.constant 0 : i32
    %c0_i32_2 = arith.constant 0 : i32
    %c0_i32_3 = arith.constant 0 : i32
    return %2, %c0_i32_1, %c0_i32_2 : i32, i32, i32
  }
  func.func @transform_3(%arg0: i32, %arg1: i32) -> (i32, i32) {
    %c0_i32 = arith.constant 0 : i32
    return %arg0, %arg0 : i32, i32
  }
  func.func @transform_4(%arg0: i32, %arg1: i32) -> (i32, i32, i32) {
    %c0_i32 = arith.constant 0 : i32
    %c0_i32_0 = arith.constant 0 : i32
    %c0_i32_1 = arith.constant 0 : i32
    return %arg1, %c0_i32, %c0_i32_0 : i32, i32, i32
  }
  func.func @transform_5(%arg0: i32, %arg1: i32) -> (i32, i32, i32) {
    %c0_i32 = arith.constant 0 : i32
    %c0_i32_0 = arith.constant 0 : i32
    %c0_i32_1 = arith.constant 0 : i32
    return %arg1, %c0_i32, %c0_i32_0 : i32, i32, i32
  }
  func.func @transform_6(%arg0: i32, %arg1: i32) -> (i32, i32, i32) {
    %c0_i32 = arith.constant 0 : i32
    %c0_i32_0 = arith.constant 0 : i32
    %c0_i32_1 = arith.constant 0 : i32
    return %arg1, %c0_i32, %c0_i32_0 : i32, i32, i32
  }
  func.func @transform_7(%arg0: i32, %arg1: i32) -> (i32, i32, i32) {
    %c0_i32 = arith.constant 0 : i32
    %c0_i32_0 = arith.constant 0 : i32
    %c0_i32_1 = arith.constant 0 : i32
    return %arg1, %c0_i32, %c0_i32_0 : i32, i32, i32
  }
  func.func @transform_8(%arg0: i32, %arg1: i32) -> (i32, i32, i32) {
    %c0_i32 = arith.constant 0 : i32
    %c0_i32_0 = arith.constant 0 : i32
    %c0_i32_1 = arith.constant 0 : i32
    return %arg1, %c0_i32, %c0_i32_0 : i32, i32, i32
  }
  func.func @transform_9(%arg0: i32, %arg1: i32) -> (i32, i32, i32) {
    %c0_i32 = arith.constant 0 : i32
    %c0_i32_0 = arith.constant 0 : i32
    %c0_i32_1 = arith.constant 0 : i32
    return %arg1, %c0_i32, %c0_i32_0 : i32, i32, i32
  }
  func.func @transform_10(%arg0: i32, %arg1: i32) -> (i32, i32, i32) {
    %c0_i32 = arith.constant 0 : i32
    %c0_i32_0 = arith.constant 0 : i32
    %c0_i32_1 = arith.constant 0 : i32
    return %arg1, %c0_i32, %c0_i32_0 : i32, i32, i32
  }
  func.func @transform_11(%arg0: i32, %arg1: i32) -> (i32, i32, i32) {
    %c0_i32 = arith.constant 0 : i32
    %c0_i32_0 = arith.constant 0 : i32
    %c0_i32_1 = arith.constant 0 : i32
    return %arg1, %c0_i32, %c0_i32_0 : i32, i32, i32
  }
  func.func @transform_12(%arg0: i32, %arg1: i32) -> (i32, i32, i32) {
    %c0_i32 = arith.constant 0 : i32
    %c0_i32_0 = arith.constant 0 : i32
    %c0_i32_1 = arith.constant 0 : i32
    return %arg1, %c0_i32, %c0_i32_0 : i32, i32, i32
  }
  func.func @transform_13(%arg0: i32, %arg1: i32) -> (i32, i32, i32) {
    %c0_i32 = arith.constant 0 : i32
    %c0_i32_0 = arith.constant 0 : i32
    %c0_i32_1 = arith.constant 0 : i32
    return %arg1, %c0_i32, %c0_i32_0 : i32, i32, i32
  }
  func.func @transform_14(%arg0: i32, %arg1: i32) -> (i32, i32, i32) {
    %c0_i32 = arith.constant 0 : i32
    %c0_i32_0 = arith.constant 0 : i32
    %c0_i32_1 = arith.constant 0 : i32
    return %arg1, %c0_i32, %c0_i32_0 : i32, i32, i32
  }
  func.func @transform_15(%arg0: i32, %arg1: i32) -> (i32, i32, i32) {
    %c0_i32 = arith.constant 0 : i32
    %c0_i32_0 = arith.constant 0 : i32
    %c0_i32_1 = arith.constant 0 : i32
    return %arg1, %c0_i32, %c0_i32_0 : i32, i32, i32
  }
  func.func @transform_16(%arg0: i32, %arg1: i32) -> (i32, i32) {
    %c0_i32 = arith.constant 0 : i32
    %c0_i32_0 = arith.constant 0 : i32
    %c0_i32_1 = arith.constant 0 : i32
    return %c0_i32, %c0_i32_0 : i32, i32
  }
  func.func @transform_17(%arg0: i32, %arg1: i32) -> (i32, i32) {
    %c0_i32 = arith.constant 0 : i32
    %c0_i32_0 = arith.constant 0 : i32
    %c0_i32_1 = arith.constant 0 : i32
    return %c0_i32, %c0_i32_0 : i32, i32
  }
  func.func @transform_18(%arg0: i32, %arg1: i32) -> (i32, i32) {
    %c0_i32 = arith.constant 0 : i32
    %c0_i32_0 = arith.constant 0 : i32
    %c0_i32_1 = arith.constant 0 : i32
    return %c0_i32, %c0_i32_0 : i32, i32
  }
  func.func @transform_19(%arg0: i32, %arg1: i32) -> (i32, i32) {
    %c0_i32 = arith.constant 0 : i32
    %c0_i32_0 = arith.constant 0 : i32
    return %arg0, %c0_i32 : i32, i32
  }
}

</mosaic_0001>

<bundles_post_ra>
// kernel: tpu_custom_call.1
= control target key start
LH: loop header
LB: loop body
LE: loop exit
PB: predicated region body
PF: predicated region fallthrough
CT: control target
= control target key end

     0   :  { %s5200_s0 = inlined_call_operand.vmem [shape: f32[4,8,32], index: 0, kind: input, shape index: {}]   ;;  %s5201_s1 = inlined_call_operand.vmem [shape: f32[8,32], index: 1, kind: input, shape index: {}]   ;;  %s5202_s2 = inlined_call_operand.vmem [shape: f32[1,8,32], index: 2, kind: input, shape index: {}]   ;;  %s5203_s3 = inlined_call_operand.vmem [shape: f32[4,32], index: 3, kind: input, shape index: {}]   ;;  %s5204_s4 = inlined_call_operand.vmem [shape: f32[2,1,32], index: 4, kind: input, shape index: {}]   ;;  %s5205_s5 = inlined_call_operand.vmem [shape: f32[2,1,32], index: 5, kind: input, shape index: {}]   ;;  %s5206_s6 = inlined_call_operand.vmem [shape: bf16[2,32,96], index: 6, kind: input, shape index: {}]   ;;  %s5207_s7 = inlined_call_operand.vmem [shape: f32[2,1,96], index: 7, kind: input, shape index: {}]   ;;  %s5208_s8 = inlined_call_operand.vmem [shape: bf16[2,32,32], index: 8, kind: input, shape index: {}]   ;;  %s5209_s9 = inlined_call_operand.vmem [shape: f32[2,1,32], index: 9, kind: input, shape index: {}]   ;;  %s5210_s10 = inlined_call_operand.vmem [shape: f32[2,1,32], index: 10, kind: input, shape index: {}]   ;;  %s5211_s11 = inlined_call_operand.vmem [shape: f32[2,1,32], index: 11, kind: input, shape index: {}]   ;;  %s5212_s12 = inlined_call_operand.vmem [shape: bf16[2,32,128], index: 12, kind: input, shape index: {}]   ;;  %s5213_s13 = inlined_call_operand.vmem [shape: f32[2,1,128], index: 13, kind: input, shape index: {}]   ;;  %s5214_s14 = inlined_call_operand.vmem [shape: bf16[2,128,32], index: 14, kind: input, shape index: {}]   ;;  %s5215_s15 = inlined_call_operand.vmem [shape: f32[2,1,32], index: 15, kind: input, shape index: {}]   ;;  %s5216_s16 = inlined_call_operand.vmem [shape: f32[1,32], index: 16, kind: input, shape index: {}]   ;;  %s5217_s17 = inlined_call_operand.vmem [shape: f32[1,32], index: 17, kind: input, shape index: {}]   ;;  %s5218_s18 = inlined_call_operand.vmem [shape: bf16[32,128], index: 18, kind: input, shape index: {}]   ;;  %s5219_s19 = inlined_call_operand.hbm [shape: f32[4,128], index: 19, kind: output, shape index: {}]  }
   0x1   :  { %5225 = sst [smem:[#allocation9_spill]] %s5200_s0 }
   0x2   :  { %5226 = sst [smem:[#allocation10_spill]] %s5201_s1 }
   0x3   :  { %5227 = sst [smem:[#allocation11_spill]] %s5202_s2 }
   0x4   :  { %5228 = sst [smem:[#allocation12_spill]] %s5203_s3 }
   0x5   :  { %5229 = sst [smem:[#allocation13_spill]] %s5206_s6 }
   0x6   :  { %5230 = sst [smem:[#allocation14_spill]] %s5208_s8 }
   0x7   :  { %5231 = sst [smem:[#allocation15_spill]] %s5216_s16 }
   0x8   :  { %5232 = sst [smem:[#allocation16_spill]] %s5217_s17 }
   0x9   :  { %5233 = sst [smem:[#allocation17_spill]] %s5218_s18 }
   0xa   :  { %5234 = sst [smem:[#allocation18_spill]] %s5219_s19 }
   0xb   :  { %24 = vsyncpa [#allocation4], 0  ;;  %s4613_s0 = smov 0   ;;  %s4615_s30 = smov 0  }
   0xc   :  { %s4617_s20 = smov 0  }
   0xd LB: > { %5235 = sst [smem:[#allocation6_spill]] %s4486_s30  ;;  %s39_s1 = sadd.s32 1, %s4486_s30  ;;  %s4490_s20 = sphi %s4617_s20, %s30_s20   ;;  %s4486_s30 = sphi %s4615_s30, %s5258_s30   ;;  %s4482_s0 = sphi %s4613_s0, %s5257_s0  }
   0xe   : > { %5236 = sst [smem:[#allocation7_spill]] %s4490_s20  ;;  %p40_p0 = scmp.ge.s32.totalorder %s39_s1, 2 }
   0xf   : > { %p3786_p1 = scmp.ge.s32.totalorder %s4490_s20, 1  ;;  %p698_p2 = scmp.lt.s32.totalorder %s4490_s20, 3 }
  0x10   : > { %s5260_s1 = smov (%p40_p0, %s39_s1), 0 }
  0x11   : > { %5237 = sst [smem:[#allocation8_spill]] %s5260_s1  ;;  %p699_p3 = pnand %p3786_p1, %p698_p2 }
  0x12   : > { %p836_p4 = scmp.lt.s32.totalorder (!%p699_p3), %s4482_s0, 1  ;;  %s5238_s6 = sld [smem:[#allocation13_spill]] (!%p699_p3) }
  0x13   : > { %702 = sbr.rel (%p699_p3) target bundleno = 5234 (0x1472), region = 96  ;;  %s5239_s8 = sld [smem:[#allocation14_spill]] (!%p699_p3) }
  0x14   : > { %p3802_p5 = scmp.ne.s32.totalorder (!%p699_p3), %s4482_s0, 0 }
  0x1a   : > { %s4636_s22 = scalar_select %p836_p4, %s4482_s0, 1 }
  0x1b   : > { %884 = sbr.rel (%p3802_p5) target bundleno = 43 (0x2b), region = 100  ;;  %s5240_s2 = sld [smem:[#allocation9_spill]] (!%p3802_p5)  ;;  %vm894_vm0 = vcmask (!%p3802_p5), 261120  }
  0x1c   : > { %s3874_s27 = sshll.u32 %s4636_s22, 4  ;;  %s860_s16 = scalar_lea.vmem %s5210_s10, %s4636_s22 }
  0x1d   : > { %s4654_s1 = scalar_lea.vmem %s5238_s6, %s3874_s27  ;;  %s4659_s20 = scalar_lea.vmem %s5239_s8, %s3874_s27 }
  0x1e   : > { %s863_s21 = scalar_lea.vmem %s5211_s11, %s4636_s22  ;;  %s4676_s6 = scalar_lea.vmem %s5212_s12, %s3874_s27 }
  0x1f   : > { %s3877_s18 = sshll.u32 %s4636_s22, 6  ;;  %s879_s28 = scalar_lea.vmem %s5215_s15, %s4636_s22 }
  0x20   : > { %s4686_s25 = scalar_lea.vmem %s5214_s14, %s3877_s18  ;;  %s5241_s30 = sld [smem:[#allocation10_spill]] (!%p3802_p5) }
  0x21   : > { %v885_v0 = vld [vmem:[%s5240_s2] sm:$0xff] (!%p3802_p5)  ;;  %v886_v2 = vld [vmem:[%s5240_s2 + $0x8] sm:$0xff] (!%p3802_p5)  ;;  %v887_v5 = vld [vmem:[%s5240_s2 + $0x10] sm:$0xff] (!%p3802_p5) }
  0x22   : > { %v888_v6 = vld [vmem:[%s5240_s2 + $0x18] sm:$0xff] }
  0x26   : > { %v889_v1 = vld [vmem:[%s5241_s30] sm:$0xff] }
  0x27   : > { %v890_v3 = vadd.f32 %v889_v1, %v885_v0  ;;  %v891_v4 = vadd.f32 %v889_v1, %v886_v2  ;;  %v892_v7 = vadd.f32 %v889_v1, %v887_v5  ;;  %v893_v8 = vadd.f32 %v889_v1, %v888_v6 }
  0x29   : > { %895 = vst.msk [vmem:[#allocation2] sm:$0xff] %vm894_vm0, %v890_v3  ;;  %896 = vst.msk [vmem:[#allocation2 + $0x8] sm:$0xff] %vm894_vm0, %v891_v4 }
  0x2a   : > { %897 = vst.msk [vmem:[#allocation2 + $0x10] sm:$0xff] %vm894_vm0, %v892_v7  ;;  %898 = vst.msk [vmem:[#allocation2 + $0x18] sm:$0xff] %vm894_vm0, %v893_v8 }
  0x2b PF: > { %p899_p6 = scmp.ge.s32.totalorder %s4482_s0, 1  ;;  %p900_p7 = scmp.le.s32.totalorder %s4482_s0, 1 }
  0x2d   : > { %p901_p8 = pnand %p900_p7, %p899_p6 }
  0x2e   : > { %v905_v9 = vlaneseq (!%p901_p8)  ;;  %s5242_s27 = sld [smem:[#allocation11_spill]] (!%p901_p8)  ;;  %vm921_vm3 = vcmask (!%p901_p8), 261120  }
  0x2f   : > { %904 = sbr.rel (%p901_p8) target bundleno = 56 (0x38), region = 104 }
  0x30   : > { %v906_v10 = vshrl.u32 (!%p901_p8), %v905_v9, 7  ;;  %v911_v12 = vld [vmem:[#allocation2] sm:$0xff] (!%p901_p8)  ;;  %v912_v13 = vld [vmem:[#allocation2 + $0x8] sm:$0xff] (!%p901_p8) }
  0x31   : > { %v913_v14 = vld [vmem:[#allocation2 + $0x10] sm:$0xff] (!%p901_p8)  ;;  %v914_v15 = vld [vmem:[#allocation2 + $0x18] sm:$0xff] (!%p901_p8) }
  0x32   : > { %vm907_vm1 = vcmp.ge.s32.totalorder (!%p901_p8), %v906_v10, 1  ;;  %vm908_vm2 = vcmp.lt.s32.totalorder (!%p901_p8), %v906_v10, 5 }
  0x33   : > { %vm909_vm4 = vmand (!%p901_p8), %vm907_vm1, %vm908_vm2 }
  0x34   : > { %v910_v11 = vld [vmem:[%s5242_s27] sm:$0xff] (!%p901_p8) }
  0x35   : > { %v917_v16 = vsel (!%p901_p8), %vm909_vm4, %v910_v11, %v911_v12  ;;  %v918_v17 = vsel (!%p901_p8), %vm909_vm4, %v910_v11, %v912_v13  ;;  %v919_v18 = vsel (!%p901_p8), %vm909_vm4, %v910_v11, %v913_v14  ;;  %v920_v19 = vsel (!%p901_p8), %vm909_vm4, %v910_v11, %v914_v15 }
  0x36   : > { %922 = vst.msk [vmem:[#allocation2] sm:$0xff] %vm921_vm3, %v917_v16  ;;  %923 = vst.msk [vmem:[#allocation2 + $0x8] sm:$0xff] %vm921_vm3, %v918_v17 }
  0x37   : > { %924 = vst.msk [vmem:[#allocation2 + $0x10] sm:$0xff] %vm921_vm3, %v919_v18  ;;  %925 = vst.msk [vmem:[#allocation2 + $0x18] sm:$0xff] %vm921_vm3, %v920_v19 }
  0x38 PF: > { %vm932_vm5 = vcmask 261120   ;;  %v4314_v48 = vld [vmem:[%s4654_s1] sm:$0xff]   ;;  %v4315_v49 = vld [vmem:[%s4654_s1 + $0x8] sm:$0xff]   ;;  %s5243_s19 = scalar_lea.vmem %s5204_s4, %s4636_s22  ;;  %s5244_s18 = scalar_lea.vmem %s5205_s5, %s4636_s22  ;;  %v4492_v18 = vmov 0.0   ;;  %vm4493_vm6 = vmmov 0   ;;  %vm1099_vm7 = vcmask 64512  }
  0x39   : > { %3972 = vmatprep.subr.bf16.mxu0 %v4314_v48  ;;  %v3803_v0 = vld [vmem:[%s5243_s19] ss:$0 sm:$0xff]  ;;  %3992 = vmatprep.subr.bf16.mxu1 %v4492_v18  ;;  %s5245_s3 = scalar_lea.vmem %s5207_s7, %s4636_s22  ;;  %s4494_s8 = smov 96   ;;  %vm1354_vm9 = vcmask 1043456   ;;  %vm2938_vm10 = vcmask 130048   ;;  %vm2943_vm11 = vcmask 195584  }
  0x3a   : > { %3973 = vmatpush3.bf16.msra.mxu0 %v4314_v48  ;;  %v3804_v6 = vld [vmem:[%s5244_s18] ss:$0 sm:$0xff]  ;;  %3994 = vmatprep.mubr.msk.bf16.mxu1 %vm4493_vm6, %v4492_v18  ;;  %s4496_s29 = smov 64   ;;  %s4497_s27 = smov 88  }
  0x3b   : > { %3974 = vmatprep.subr.bf16.mxu0 %v4315_v49  ;;  %v3805_v19 = vld [vmem:[%s5245_s3] ss:$0 sm:$0xff]  ;;  %s4498_s1 = smov 120   ;;  %s4499_s23 = smov 56  }
  0x3c   : > { %s4500_s19 = smov 80   ;;  %s4501_s30 = smov 112  }
  0x3d   : > { %s4502_s17 = smov 48   ;;  %s4503_s18 = smov 72  }
  0x3e   : > { %v928_v21 = vld [vmem:[#allocation2 + $0x10] sm:$0xff]  ;;  %v929_v25 = vld [vmem:[#allocation2 + $0x18] sm:$0xff]  ;;  %3975 = vmatpush3.bf16.msra.mxu0 %v4315_v49  ;;  %s4504_s24 = smov 104   ;;  %s4505_s26 = smov 40  }
  0x3f   : > { %v926_v20 = vld [vmem:[#allocation2] sm:$0xff]  ;;  %v927_v22 = vld [vmem:[#allocation2 + $0x8] sm:$0xff]  ;;  %v939_v24 = vsel %vm932_vm5, %v928_v21, 0.0  ;;  %v942_v27 = vsel %vm932_vm5, %v929_v25, 0.0  ;;  %3980 = vmatprep.subr.bf16.mxu0 %v4492_v18  ;;  %s4506_s3 = smov 8   ;;  %p3863_p9 = scmp.ne.s32.totalorder %s4482_s0, 1 }
  0x40   : > { %v933_v23 = vsel %vm932_vm5, %v926_v20, 0.0  ;;  %940 = vadd.xlane.f32.xlu1 %v939_v24  ;;  %v936_v26 = vsel %vm932_vm5, %v927_v22, 0.0  ;;  %vm4510_vm12 = vmmov (!%p3863_p9), 0  }
  0x41   : > { %934 = vadd.xlane.f32.xlu0 %v933_v23 }
  0x44   : > { %943 = vadd.xlane.f32.xlu1 %v942_v27 }
  0x45   : > { %937 = vadd.xlane.f32.xlu0 %v936_v26 }
  0xcd   : > { %v941_v29 = vpop.xlane.xlu1 %940 }
  0xce   : > { %v935_v28 = vpop.xlane.xlu0 %934  ;;  %v948_v31 = vmul.f32 0.03125, %v941_v29 }
  0xcf   : > { %v946_v30 = vmul.f32 0.03125, %v935_v28 }
  0xd0   : > { %v952_v33 = vsub.f32 %v928_v21, %v948_v31 }
  0xd1   : > { %v950_v32 = vsub.f32 %v926_v20, %v946_v30  ;;  %v944_v35 = vpop.xlane.xlu1 %943 }
  0xd2   : > { %v938_v34 = vpop.xlane.xlu0 %937  ;;  %v949_v37 = vmul.f32 0.03125, %v944_v35  ;;  %v956_v39 = vmul.f32 %v952_v33, %v952_v33 }
  0xd3   : > { %v947_v36 = vmul.f32 0.03125, %v938_v34  ;;  %v954_v38 = vmul.f32 %v950_v32, %v950_v32 }
  0xd4   : > { %v953_v41 = vsub.f32 %v929_v25, %v949_v37  ;;  %v964_v43 = vsel %vm932_vm5, %v956_v39, 0.0 }
  0xd5   : > { %v951_v40 = vsub.f32 %v927_v22, %v947_v36  ;;  %v958_v42 = vsel %vm932_vm5, %v954_v38, 0.0 }
  0xd6   : > { %959 = vadd.xlane.f32.xlu0 %v958_v42  ;;  %v957_v45 = vmul.f32 %v953_v41, %v953_v41 }
  0xd7   : > { %v955_v44 = vmul.f32 %v951_v40, %v951_v40 }
  0xd8   : > { %v967_v47 = vsel %vm932_vm5, %v957_v45, 0.0 }
  0xd9   : > { %v961_v46 = vsel %vm932_vm5, %v955_v44, 0.0  ;;  %v4495_v44 = vmov -1e+09  }
  0xda   : > { %965 = vadd.xlane.f32.xlu0 %v964_v43  ;;  %962 = vadd.xlane.f32.xlu1 %v961_v46 }
  0xde   : > { %968 = vadd.xlane.f32.xlu1 %v967_v47 }
 0x163   : > { %v960_v50 = vpop.xlane.xlu0 %959 }
 0x164   : > { %v970_v51 = vmul.f32 0.03125, %v960_v50 }
 0x166   : > { %v974_v52 = vadd.f32 1e-05, %v970_v51 }
 0x167   : > { %v963_v53 = vpop.xlane.xlu1 %962  ;;  %v966_v54 = vpop.xlane.xlu0 %965 }
 0x168   : > { %4328 = vrsqrt.f32 %v974_v52  ;;  %v971_v55 = vmul.f32 0.03125, %v963_v53  ;;  %v972_v56 = vmul.f32 0.03125, %v966_v54 }
 0x16a   : > { %v975_v57 = vadd.f32 1e-05, %v971_v55  ;;  %v976_v58 = vadd.f32 1e-05, %v972_v56 }
 0x16b   : > { %v969_v59 = vpop.xlane.xlu1 %968 }
 0x16c   : > { %4330 = vrsqrt.f32 %v975_v57  ;;  %v973_v60 = vmul.f32 0.03125, %v969_v59 }
 0x16d   : > { %4332 = vrsqrt.f32 %v976_v58 }
 0x16e   : > { %v977_v61 = vadd.f32 1e-05, %v973_v60 }
 0x170   : > { %4334 = vrsqrt.f32 %v977_v61 }
 0x172   : > { %v4329_v62 = vpop.eup %4328 }
 0x173   : > { %v982_v63 = vmul.f32 %v4329_v62, %v950_v32 }
 0x175   : > { %v992_v4 = vmul.f32 %v3803_v0, %v982_v63 }
 0x176   : > { %v4331_v1 = vpop.eup %4330 }
 0x177   : > { %v4333_v2 = vpop.eup %4332  ;;  %v983_v3 = vmul.f32 %v4331_v1, %v951_v40  ;;  %v1002_v10 = vadd.f32 %v3804_v6, %v992_v4  ;;  %v1086_v40 = vlaneseq }
 0x178   : > { %v984_v5 = vmul.f32 %v4333_v2, %v952_v33 }
 0x179   : > { %v993_v7 = vmul.f32 %v3803_v0, %v983_v3  ;;  %v1089_v42 = vand.u32 127, %v1086_v40 }
 0x17a   : > { %v4335_v8 = vpop.eup %4334  ;;  %v994_v12 = vmul.f32 %v3803_v0, %v984_v5 }
 0x17b   : > { %v985_v9 = vmul.f32 %v4335_v8, %v953_v41  ;;  %v1003_v11 = vadd.f32 %v3804_v6, %v993_v7  ;;  %v1087_v41 = vshrl.u32 %v1086_v40, 7 }
 0x17c   : > { %v1004_v15 = vadd.f32 %v3804_v6, %v994_v12 }
 0x17d   : > { %v1006_v13 = vpack.c.bf16 %v1003_v11, %v1002_v10  ;;  %v995_v14 = vmul.f32 %v3803_v0, %v985_v9  ;;  %vm1090_vm8 = vcmp.le.s32.totalorder %v1089_v42, %v1087_v41 }
 0x17e   : > { %v4782_v45 = vsel %vm1090_vm8, 0.0, %v4495_v44 }
 0x17f   : > { %3976 = vmatprep.mubr.msk.bf16.mxu0 %vm932_vm5, %v1006_v13  ;;  %v1005_v16 = vadd.f32 %v3804_v6, %v995_v14 }
 0x181   : > { %v1007_v17 = vpack.c.bf16 %v1005_v16, %v1004_v15 }
 0x183   : > { %3977 = vmatmul.mubr.msk.bf16.vlgmr.msra.gmra.mrb[0].mxu0 %vm932_vm5, %v1007_v17 }
 0x184   : > { %3982 = vmatprep.mubr.msk.bf16.mxu0 %vm4493_vm6, %v4492_v18 }
 0x256   : > { %v3978_v20 = vpop.f32.mrb[0].mxu0 }
 0x257   : > { %v1071_v21 = vpop.f32.mrb[1].mxu0  ;;  %v1080_v27 = vadd.f32 %v3978_v20, %v3805_v19 }
 0x258   : > { %v1072_v22 = vadd.f32 %v3805_v19, %v1071_v21  ;;  %v3979_v23 = vpop.f32.mrb[2].mxu0 }
 0x259   : > { %v1074_v24 = vpop.f32.mrb[3].mxu0  ;;  %v4752_v29 = vpack.c.bf16 %v1080_v27, %v1080_v27  ;;  %v1083_v30 = vadd.f32 %v3979_v23, %v3805_v19 }
 0x25a   : > { %v4746_v25 = vpack.c.bf16 %v1072_v22, %v1072_v22  ;;  %v1075_v26 = vadd.f32 %v3805_v19, %v1074_v24 }
 0x25b   : > { %v4755_v31 = vpack.c.bf16 %v1083_v30, %v1083_v30 }
 0x25c   : > { %v4748_v28 = vpack.c.bf16 %v1075_v26, %v1075_v26  ;;  %1097 = vrot.lane.b32.xlu0 %v4746_v25, %s4494_s8 }
 0x25e   : > { %1147 = vrot.lane.b32.xlu1 %v4748_v28, %s4494_s8 }
 0x262   : > { %1196 = vrot.lane.b32.xlu1 %v4752_v29, %s4494_s8 }
 0x266   : > { %1245 = vrot.lane.b32.xlu1 %v4755_v31, %s4494_s8  ;;  %s4507_s8 = smov 16  }
 0x2ce   : > { %v1098_v32 = vpop.permute.xlu0 %1097 }
 0x2cf   : > { %v1104_v33 = vsel %vm1099_vm7, %v1098_v32, 0 }
 0x2d0   : > { %v1148_v34 = vpop.permute.xlu1 %1147  ;;  %3981 = vmatpush3.bf16.xpose.msra.mxu0 %v1104_v33 }
 0x2d1   : > { %3986 = vmatprep.subr.bf16.mxu0 %v4492_v18  ;;  %v1153_v37 = vsel %vm1099_vm7, %v1148_v34, 0 }
 0x2d4   : > { %v1197_v35 = vpop.permute.xlu1 %1196 }
 0x2d5   : > { %v1202_v36 = vsel %vm1099_vm7, %v1197_v35, 0 }
 0x2d6   : > { %3993 = vmatpush3.bf16.xpose.msra.mxu1 %v1202_v36 }
 0x2d7   : > { %3983 = vmatmul.mubr.msk.bf16.vlgmr.msra.gmra.mrb[4].mxu0 %vm1099_vm7, %v4746_v25  ;;  %4004 = vmatprep.subr.bf16.mxu1 %v4492_v18 }
 0x2d8   : > { %3987 = vmatpush3.bf16.xpose.msra.mxu0 %v1153_v37  ;;  %3988 = vmatprep.mubr.msk.bf16.mxu0 %vm4493_vm6, %v4492_v18  ;;  %v1246_v38 = vpop.permute.xlu1 %1245 }
 0x2d9   : > { %3998 = vmatprep.subr.bf16.mxu0 %v4492_v18  ;;  %v1251_v39 = vsel %vm1099_vm7, %v1246_v38, 0 }
 0x2dd   : > { %3995 = vmatmul.mubr.msk.bf16.vlgmr.msra.gmra.mrb[0].mxu1 %vm1099_vm7, %v4752_v29 }
 0x2de   : > { %4006 = vmatprep.mubr.msk.bf16.mxu1 %vm4493_vm6, %v4492_v18 }
 0x2df   : > { %3989 = vmatmul.mubr.msk.bf16.vlgmr.msra.gmra.mrb[8].mxu0 %vm1099_vm7, %v4748_v28 }
 0x2e0   : > { %3999 = vmatpush3.bf16.xpose.msra.mxu0 %v1251_v39  ;;  %4000 = vmatprep.mubr.msk.bf16.mxu0 %vm4493_vm6, %v4492_v18 }
 0x2e1   : > { %4010 = vmatprep.subr.bf16.mxu0 %v4492_v18 }
 0x2e7   : > { %4001 = vmatmul.mubr.msk.bf16.vlgmr.msra.gmra.mrb[12].mxu0 %vm1099_vm7, %v4755_v31 }
 0x2e8   : > { %4012 = vmatprep.mubr.msk.bf16.mxu0 %vm4493_vm6, %v4492_v18 }
 0x3aa   : > { %v1140_v43 = vpop.f32.mrb[4].mxu0 }
 0x3ab   : > { %v1293_v46 = vmul.f32 0.35355338, %v1140_v43  ;;  %v3984_v47 = vpop.f32.mrb[5].mxu0 }
 0x3ac   : > { %v1143_v48 = vpop.f32.mrb[6].mxu0 }
 0x3ad   : > { %v3985_v49 = vpop.f32.mrb[7].mxu0  ;;  %v1297_v50 = vadd.f32 %v1293_v46, %v4782_v45 }
 0x3af   : > { %v1301_v51 = vsel %vm1099_vm7, %v1297_v50, -inf }
 0x3b0   : > { %v1238_v52 = vpop.f32.mrb[0].mxu1  ;;  %1302 = vmax.xlane.f32.xlu0 %v1301_v51 }
 0x3b1   : > { %v1295_v53 = vmul.f32 0.35355338, %v1238_v52  ;;  %v3996_v54 = vpop.f32.mrb[1].mxu1 }
 0x3b2   : > { %v1189_v55 = vpop.f32.mrb[8].mxu0  ;;  %v1241_v56 = vpop.f32.mrb[2].mxu1 }
 0x3b3   : > { %v1294_v57 = vmul.f32 0.35355338, %v1189_v55  ;;  %v3990_v58 = vpop.f32.mrb[9].mxu0  ;;  %v3997_v59 = vpop.f32.mrb[3].mxu1  ;;  %v1299_v60 = vadd.f32 %v1295_v53, %v4782_v45 }
 0x3b4   : > { %v1192_v61 = vpop.f32.mrb[10].mxu0 }
 0x3b5   : > { %v3991_v62 = vpop.f32.mrb[11].mxu0  ;;  %v1307_v63 = vsel %vm1099_vm7, %v1299_v60, -inf  ;;  %v1298_v0 = vadd.f32 %v1294_v57, %v4782_v45 }
 0x3b6   : > { %1308 = vmax.xlane.f32.xlu0 %v1307_v63 }
 0x3b7   : > { %v1304_v1 = vsel %vm1099_vm7, %v1298_v0, -inf }
 0x3b8   : > { %1305 = vmax.xlane.f32.xlu1 %v1304_v1 }
 0x3ba   : > { %v1287_v2 = vpop.f32.mrb[12].mxu0 }
 0x3bb   : > { %v1296_v3 = vmul.f32 0.35355338, %v1287_v2  ;;  %v4002_v4 = vpop.f32.mrb[13].mxu0 }
 0x3bc   : > { %v1290_v5 = vpop.f32.mrb[14].mxu0 }
 0x3bd   : > { %v4003_v6 = vpop.f32.mrb[15].mxu0  ;;  %v1300_v7 = vadd.f32 %v1296_v3, %v4782_v45 }
 0x3bf   : > { %v1310_v8 = vsel %vm1099_vm7, %v1300_v7, -inf }
 0x3c0   : > { %1311 = vmax.xlane.f32.xlu0 %v1310_v8 }
 0x3c9   : > { %1398 = vrot.lane.b32.xlu1 %v4748_v28, %s4496_s29 }
 0x3cd   : > { %1446 = vrot.lane.b32.xlu1 %v4752_v29, %s4496_s29 }
 0x3d1   : > { %1494 = vrot.lane.b32.xlu1 %v4755_v31, %s4496_s29 }
 0x43d   : > { %v1303_v9 = vpop.xlane.xlu0 %1302 }
 0x43e   : > { %v1313_v10 = vsub.f32 %v1297_v50, %v1303_v9 }
 0x440   : > { %v1317_v13 = vmul.f32 1.442695, %v1313_v10 }
 0x443   : > { %v1309_v11 = vpop.xlane.xlu0 %1308 }
 0x444   : > { %v1315_v12 = vsub.f32 %v1299_v60, %v1309_v11 }
 0x445   : > { %v1306_v14 = vpop.xlane.xlu1 %1305 }
 0x446   : > { %v1321_v15 = vmul.f32 1.442695, %v1315_v12  ;;  %v1314_v16 = vsub.f32 %v1298_v0, %v1306_v14 }
 0x448   : > { %4336 = vpow2.f32 %v1321_v15  ;;  %v1319_v17 = vmul.f32 1.442695, %v1314_v16 }
 0x449   : > { %4338 = vpow2.f32 %v1317_v13  ;;  %v1399_v19 = vpop.permute.xlu1 %1398 }
 0x44a   : > { %4340 = vpow2.f32 %v1319_v17  ;;  %v1404_v20 = vsel %vm1354_vm9, %v1399_v19, 0 }
 0x44b   : > { %4011 = vmatpush3.bf16.msra.mxu0 %v1404_v20 }
 0x44c   : > { %4022 = vmatprep.subr.bf16.mxu0 %v4492_v18 }
 0x44d   : > { %v1312_v30 = vpop.xlane.xlu0 %1311  ;;  %v1447_v36 = vpop.permute.xlu1 %1446 }
 0x44e   : > { %v1316_v32 = vsub.f32 %v1300_v7, %v1312_v30  ;;  %v1452_v52 = vsel %vm1354_vm9, %v1447_v36, 0 }
 0x450   : > { %v1323_v33 = vmul.f32 1.442695, %v1316_v32 }
 0x451   : > { %v1495_v37 = vpop.permute.xlu1 %1494 }
 0x452   : > { %v4337_v21 = vpop.eup %4336  ;;  %4342 = vpow2.f32 %v1323_v33  ;;  %v1500_v49 = vsel %vm1354_vm9, %v1495_v37, 0 }
 0x453   : > { %v4339_v22 = vpop.eup %4338  ;;  %v1331_v23 = vsel %vm1099_vm7, %v4337_v21, 0.0 }
 0x454   : > { %v4341_v24 = vpop.eup %4340  ;;  %1332 = vadd.xlane.f32.xlu0 %v1331_v23  ;;  %v1325_v27 = vsel %vm1099_vm7, %v4339_v22, 0.0 }
 0x455   : > { %v1328_v26 = vsel %vm1099_vm7, %v4341_v24, 0.0 }
 0x456   : > { %1329 = vadd.xlane.f32.xlu1 %v1328_v26 }
 0x458   : > { %1326 = vadd.xlane.f32.xlu0 %v1325_v27 }
 0x45c   : > { %v4343_v34 = vpop.eup %4342 }
 0x45d   : > { %v1334_v35 = vsel %vm1099_vm7, %v4343_v34, 0.0 }
 0x467   : > { %1594 = vrot.lane.b32.xlu1 %v4748_v28, %s4497_s27 }
 0x46e   : > { %1349 = vrot.lane.b32.xlu0 %v4746_v25, %s4496_s29  ;;  %s4508_s29 = smov 24  }
 0x472   : > { %1544 = vrot.lane.b32.xlu0 %v4746_v25, %s4497_s27 }
 0x476   : > { %1542 = vrot.lane.b32.xlu0 %v4746_v25, %s4498_s1 }
 0x47a   : > { %1644 = vrot.lane.b32.xlu0 %v4752_v29, %s4497_s27 }
 0x47e   : > { %1642 = vrot.lane.b32.xlu0 %v4752_v29, %s4498_s1 }
 0x48b   : > { %1335 = vadd.xlane.f32.xlu1 %v1334_v35 }
 0x49c   : > { %1592 = vrot.lane.b32.xlu1 %v4748_v28, %s4498_s1 }
 0x4a0   : > { %1694 = vrot.lane.b32.xlu1 %v4755_v31, %s4497_s27 }
 0x4a4   : > { %1692 = vrot.lane.b32.xlu1 %v4755_v31, %s4498_s1  ;;  %s5246_s1 = scalar_lea.vmem %s5209_s9, %s4636_s22 }
 0x4e1   : > { %v1333_v38 = vpop.xlane.xlu0 %1332 }
 0x4e3   : > { %v1330_v39 = vpop.xlane.xlu1 %1329 }
 0x4e4   : > { %4344 = vrcp.f32 %v1330_v39 }
 0x4e5   : > { %v1327_v40 = vpop.xlane.xlu0 %1326 }
 0x4e6   : > { %4346 = vrcp.f32 %v1327_v40 }
 0x4e7   : > { %4348 = vrcp.f32 %v1333_v38  ;;  %v1595_v61 = vpop.permute.xlu1 %1594 }
 0x4e8   : > { %v1600_v3 = vsel %vm1099_vm7, %v1595_v61, 0 }
 0x4e9   : > { %v1350_v41 = vpop.permute.xlu0 %1349 }
 0x4ea   : > { %v1356_v42 = vsel %vm1354_vm9, %v1350_v41, 0 }
 0x4eb   : > { %4005 = vmatpush3.bf16.msra.mxu1 %v1356_v42 }
 0x4ec   : > { %4016 = vmatprep.subr.bf16.mxu1 %v4492_v18 }
 0x4ed   : > { %v1545_v54 = vpop.permute.xlu0 %1544 }
 0x4ee   : > { %v4345_v43 = vpop.eup %4344  ;;  %v1550_v57 = vsel %vm1099_vm7, %v1545_v54, 0 }
 0x4ef   : > { %v1342_v44 = vmul.f32 %v4345_v43, %v4341_v24 }
 0x4f0   : > { %v4347_v46 = vpop.eup %4346 }
 0x4f1   : > { %v1341_v47 = vmul.f32 %v4347_v46, %v4339_v22  ;;  %v1346_v48 = vpack.c.bf16 %v1342_v44, %v1342_v44  ;;  %v4349_v51 = vpop.eup %4348  ;;  %v1543_v56 = vpop.permute.xlu0 %1542 }
 0x4f2   : > { %v1343_v53 = vmul.f32 %v4349_v51, %v4337_v21 }
 0x4f3   : > { %4013 = vmatmul.mubr.msk.bf16.vlgmr.msra.gmra.mrb[16].mxu0 %vm1099_vm7, %v1346_v48  ;;  %v1345_v50 = vpack.c.bf16 %v1341_v47, %v1341_v47 }
 0x4f4   : > { %4023 = vmatpush3.bf16.msra.mxu0 %v1500_v49  ;;  %4024 = vmatprep.mubr.msk.bf16.mxu0 %vm4493_vm6, %v4492_v18  ;;  %v1347_v55 = vpack.c.bf16 %v1343_v53, %v1343_v53 }
 0x4f5   : > { %4007 = vmatmul.mubr.msk.bf16.vlgmr.msra.gmra.mrb[4].mxu1 %vm1099_vm7, %v1345_v50  ;;  %4034 = vmatprep.subr.bf16.mxu0 %v4492_v18  ;;  %v1645_v58 = vpop.permute.xlu0 %1644 }
 0x4f6   : > { %4017 = vmatpush3.bf16.msra.mxu1 %v1452_v52  ;;  %4018 = vmatprep.mubr.msk.bf16.mxu1 %vm4493_vm6, %v4492_v18  ;;  %v1650_v59 = vsel %vm1099_vm7, %v1645_v58, 0 }
 0x4f7   : > { %4028 = vmatprep.subr.bf16.mxu1 %v4492_v18 }
 0x4f9   : > { %v1643_v60 = vpop.permute.xlu0 %1642 }
 0x4fd   : > { %4019 = vmatmul.mubr.msk.bf16.vlgmr.msra.gmra.mrb[8].mxu1 %vm1099_vm7, %v1347_v55 }
 0x4fe   : > { %4030 = vmatprep.mubr.msk.bf16.mxu1 %vm4493_vm6, %v4492_v18 }
 0x4ff   : > { %4029 = vmatpush3.bf16.xpose.msra.mxu1 %v1550_v57 }
 0x500   : > { %4040 = vmatprep.subr.bf16.mxu1 %v4492_v18 }
 0x506   : > { %4031 = vmatmul.mubr.msk.bf16.vlgmr.msra.gmra.mrb[12].mxu1 %vm1099_vm7, %v1543_v56 }
 0x507   : > { %4041 = vmatpush3.bf16.xpose.msra.mxu1 %v1650_v59  ;;  %4042 = vmatprep.mubr.msk.bf16.mxu1 %vm4493_vm6, %v4492_v18 }
 0x508   : > { %4052 = vmatprep.subr.bf16.mxu1 %v4492_v18 }
 0x50e   : > { %4043 = vmatmul.mubr.msk.bf16.vlgmr.msra.gmra.mrb[16].mxu1 %vm1099_vm7, %v1643_v60 }
 0x50f   : > { %4054 = vmatprep.mubr.msk.bf16.mxu1 %vm4493_vm6, %v4492_v18 }
 0x518   : > { %v1336_v62 = vpop.xlane.xlu1 %1335 }
 0x519   : > { %4350 = vrcp.f32 %v1336_v62 }
 0x51c   : > { %v1593_v2 = vpop.permute.xlu1 %1592 }
 0x520   : > { %v1695_v4 = vpop.permute.xlu1 %1694 }
 0x521   : > { %v1700_v5 = vsel %vm1099_vm7, %v1695_v4, 0 }
 0x523   : > { %v4351_v63 = vpop.eup %4350 }
 0x524   : > { %v1344_v0 = vmul.f32 %v4351_v63, %v4343_v34  ;;  %v1693_v6 = vpop.permute.xlu1 %1692 }
 0x526   : > { %v1348_v1 = vpack.c.bf16 %v1344_v0, %v1344_v0 }
 0x528   : > { %4025 = vmatmul.mubr.msk.bf16.vlgmr.msra.gmra.mrb[20].mxu0 %vm1099_vm7, %v1348_v1 }
 0x529   : > { %4035 = vmatpush3.bf16.xpose.msra.mxu0 %v1600_v3  ;;  %4036 = vmatprep.mubr.msk.bf16.mxu0 %vm4493_vm6, %v4492_v18 }
 0x52a   : > { %4046 = vmatprep.subr.bf16.mxu0 %v4492_v18 }
 0x530   : > { %4037 = vmatmul.mubr.msk.bf16.vlgmr.msra.gmra.mrb[24].mxu0 %vm1099_vm7, %v1593_v2 }
 0x531   : > { %4047 = vmatpush3.bf16.xpose.msra.mxu0 %v1700_v5  ;;  %4048 = vmatprep.mubr.msk.bf16.mxu0 %vm4493_vm6, %v4492_v18 }
 0x532   : > { %4058 = vmatprep.subr.bf16.mxu0 %v4492_v18 }
 0x538   : > { %4049 = vmatmul.mubr.msk.bf16.vlgmr.msra.gmra.mrb[28].mxu0 %vm1099_vm7, %v1693_v6 }
 0x539   : > { %4060 = vmatprep.mubr.msk.bf16.mxu0 %vm4493_vm6, %v4492_v18 }
 0x5c6   : > { %v4852_v7 = vpop.f32.mrb[16].mxu0 }
 0x5c7   : > { %v4014_v8 = vpop.f32.mrb[17].mxu0 }
 0x5c8   : > { %v4854_v9 = vpop.f32.mrb[4].mxu1  ;;  %v1443_v10 = vpop.f32.mrb[18].mxu0 }
 0x5c9   : > { %v4008_v11 = vpop.f32.mrb[5].mxu1  ;;  %v4015_v12 = vpop.f32.mrb[19].mxu0 }
 0x5ca   : > { %v1395_v13 = vpop.f32.mrb[6].mxu1 }
 0x5cb   : > { %v4009_v14 = vpop.f32.mrb[7].mxu1 }
 0x5d0   : > { %v4856_v15 = vpop.f32.mrb[8].mxu1 }
 0x5d1   : > { %v4020_v16 = vpop.f32.mrb[9].mxu1 }
 0x5d2   : > { %v1491_v17 = vpop.f32.mrb[10].mxu1 }
 0x5d3   : > { %v4021_v19 = vpop.f32.mrb[11].mxu1 }
 0x5d9   : > { %v1586_v20 = vpop.f32.mrb[12].mxu1 }
 0x5da   : > { %v1742_v21 = vmul.f32 0.35355338, %v1586_v20  ;;  %v4032_v22 = vpop.f32.mrb[13].mxu1 }
 0x5db   : > { %v1589_v23 = vpop.f32.mrb[14].mxu1 }
 0x5dc   : > { %v4033_v24 = vpop.f32.mrb[15].mxu1  ;;  %v1746_v26 = vadd.f32 %v1742_v21, %v4782_v45 }
 0x5de   : > { %v1750_v27 = vsel %vm1099_vm7, %v1746_v26, -inf }
 0x5df   : > { %1751 = vmax.xlane.f32.xlu0 %v1750_v27 }
 0x5e1   : > { %v1686_v30 = vpop.f32.mrb[16].mxu1 }
 0x5e2   : > { %v1744_v32 = vmul.f32 0.35355338, %v1686_v30  ;;  %v4044_v33 = vpop.f32.mrb[17].mxu1 }
 0x5e3   : > { %v1689_v34 = vpop.f32.mrb[18].mxu1 }
 0x5e4   : > { %v4045_v35 = vpop.f32.mrb[19].mxu1  ;;  %v1748_v36 = vadd.f32 %v1744_v32, %v4782_v45 }
 0x5e6   : > { %v1756_v37 = vsel %vm1099_vm7, %v1748_v36, -inf }
 0x5e7   : > { %1757 = vmax.xlane.f32.xlu0 %v1756_v37 }
 0x5fb   : > { %v4862_v38 = vpop.f32.mrb[20].mxu0 }
 0x5fc   : > { %v4026_v39 = vpop.f32.mrb[21].mxu0 }
 0x5fd   : > { %v1539_v40 = vpop.f32.mrb[22].mxu0 }
 0x5fe   : > { %v4027_v41 = vpop.f32.mrb[23].mxu0 }
 0x603   : > { %v1636_v42 = vpop.f32.mrb[24].mxu0 }
 0x604   : > { %v1743_v43 = vmul.f32 0.35355338, %v1636_v42  ;;  %v4038_v44 = vpop.f32.mrb[25].mxu0 }
 0x605   : > { %v1639_v46 = vpop.f32.mrb[26].mxu0 }
 0x606   : > { %v4039_v47 = vpop.f32.mrb[27].mxu0  ;;  %v1747_v48 = vadd.f32 %v1743_v43, %v4782_v45 }
 0x608   : > { %v1753_v49 = vsel %vm1099_vm7, %v1747_v48, -inf }
 0x609   : > { %1754 = vmax.xlane.f32.xlu1 %v1753_v49 }
 0x60b   : > { %v1736_v50 = vpop.f32.mrb[28].mxu0 }
 0x60c   : > { %v1745_v51 = vmul.f32 0.35355338, %v1736_v50  ;;  %v4050_v52 = vpop.f32.mrb[29].mxu0 }
 0x60d   : > { %v1739_v53 = vpop.f32.mrb[30].mxu0 }
 0x60e   : > { %v4051_v54 = vpop.f32.mrb[31].mxu0  ;;  %v1749_v55 = vadd.f32 %v1745_v51, %v4782_v45 }
 0x610   : > { %v1759_v56 = vsel %vm1099_vm7, %v1749_v55, -inf }
 0x611   : > { %1760 = vmax.xlane.f32.xlu0 %v1759_v56 }
 0x61a   : > { %1846 = vrot.lane.b32.xlu1 %v4748_v28, %s4499_s23 }
 0x61e   : > { %1894 = vrot.lane.b32.xlu1 %v4752_v29, %s4499_s23 }
 0x622   : > { %1942 = vrot.lane.b32.xlu1 %v4755_v31, %s4499_s23 }
 0x66c   : > { %v1752_v57 = vpop.xlane.xlu0 %1751 }
 0x66d   : > { %v1762_v58 = vsub.f32 %v1746_v26, %v1752_v57 }
 0x66f   : > { %v1766_v59 = vmul.f32 1.442695, %v1762_v58 }
 0x671   : > { %4352 = vpow2.f32 %v1766_v59 }
 0x674   : > { %v1758_v0 = vpop.xlane.xlu0 %1757 }
 0x675   : > { %v1764_v4 = vsub.f32 %v1748_v36, %v1758_v0 }
 0x677   : > { %v1770_v5 = vmul.f32 1.442695, %v1764_v4 }
 0x67b   : > { %v4353_v60 = vpop.eup %4352 }
 0x67c   : > { %v1774_v61 = vsel %vm1099_vm7, %v4353_v60, 0.0 }
 0x67d   : > { %1775 = vadd.xlane.f32.xlu0 %v1774_v61 }
 0x693   : > { %1798 = vrot.lane.b32.xlu0 %v4746_v25, %s4499_s23 }
 0x696   : > { %v1755_v62 = vpop.xlane.xlu1 %1754 }
 0x697   : > { %v1763_v63 = vsub.f32 %v1747_v48, %v1755_v62 }
 0x699   : > { %v1768_v1 = vmul.f32 1.442695, %v1763_v63 }
 0x69a   : > { %v1847_v2 = vpop.permute.xlu1 %1846 }
 0x69b   : > { %4354 = vpow2.f32 %v1768_v1  ;;  %v1852_v3 = vsel %vm1354_vm9, %v1847_v2, 0 }
 0x69c   : > { %4059 = vmatpush3.bf16.msra.mxu0 %v1852_v3  ;;  %4356 = vpow2.f32 %v1770_v5 }
 0x69d   : > { %4070 = vmatprep.subr.bf16.mxu0 %v4492_v18 }
 0x69e   : > { %v1761_v12 = vpop.xlane.xlu0 %1760  ;;  %v1895_v24 = vpop.permute.xlu1 %1894 }
 0x69f   : > { %v1765_v13 = vsub.f32 %v1749_v55, %v1761_v12  ;;  %v1900_v27 = vsel %vm1354_vm9, %v1895_v24, 0 }
 0x6a1   : > { %v1772_v14 = vmul.f32 1.442695, %v1765_v13 }
 0x6a2   : > { %v1943_v30 = vpop.permute.xlu1 %1942 }
 0x6a3   : > { %4358 = vpow2.f32 %v1772_v14  ;;  %v1948_v37 = vsel %vm1354_vm9, %v1943_v30, 0 }
 0x6a5   : > { %v4355_v6 = vpop.eup %4354 }
 0x6a6   : > { %v1777_v8 = vsel %vm1099_vm7, %v4355_v6, 0.0  ;;  %v4357_v10 = vpop.eup %4356 }
 0x6a7   : > { %1778 = vadd.xlane.f32.xlu1 %v1777_v8  ;;  %v1780_v11 = vsel %vm1099_vm7, %v4357_v10, 0.0 }
 0x6ad   : > { %v4359_v16 = vpop.eup %4358 }
 0x6ae   : > { %v1783_v17 = vsel %vm1099_vm7, %v4359_v16, 0.0 }
 0x6b2   : > { %1781 = vadd.xlane.f32.xlu0 %v1780_v11 }
 0x6b8   : > { %2042 = vrot.lane.b32.xlu1 %v4748_v28, %s4500_s19 }
 0x6c8   : > { %1992 = vrot.lane.b32.xlu0 %v4746_v25, %s4500_s19 }
 0x6cc   : > { %1990 = vrot.lane.b32.xlu0 %v4746_v25, %s4501_s30 }
 0x6d0   : > { %2092 = vrot.lane.b32.xlu0 %v4752_v29, %s4500_s19 }
 0x6d4   : > { %2090 = vrot.lane.b32.xlu0 %v4752_v29, %s4501_s30 }
 0x6dc   : > { %1784 = vadd.xlane.f32.xlu1 %v1783_v17 }
 0x6ed   : > { %2040 = vrot.lane.b32.xlu1 %v4748_v28, %s4501_s30 }
 0x6f1   : > { %2142 = vrot.lane.b32.xlu1 %v4755_v31, %s4500_s19 }
 0x6f5   : > { %2140 = vrot.lane.b32.xlu1 %v4755_v31, %s4501_s30 }
 0x70a   : > { %v1776_v19 = vpop.xlane.xlu0 %1775 }
 0x70b   : > { %4360 = vrcp.f32 %v1776_v19 }
 0x70e   : > { %v1799_v20 = vpop.permute.xlu0 %1798 }
 0x70f   : > { %v1804_v21 = vsel %vm1354_vm9, %v1799_v20, 0 }
 0x710   : > { %4053 = vmatpush3.bf16.msra.mxu1 %v1804_v21 }
 0x711   : > { %4064 = vmatprep.subr.bf16.mxu1 %v4492_v18 }
 0x715   : > { %v4361_v22 = vpop.eup %4360 }
 0x716   : > { %v1790_v23 = vmul.f32 %v4361_v22, %v4353_v60 }
 0x718   : > { %v1794_v26 = vpack.c.bf16 %v1790_v23, %v1790_v23 }
 0x71a   : > { %4055 = vmatmul.mubr.msk.bf16.vlgmr.msra.gmra.mrb[20].mxu1 %vm1099_vm7, %v1794_v26 }
 0x71b   : > { %4065 = vmatpush3.bf16.msra.mxu1 %v1900_v27  ;;  %4066 = vmatprep.mubr.msk.bf16.mxu1 %vm4493_vm6, %v4492_v18 }
 0x71c   : > { %4076 = vmatprep.subr.bf16.mxu1 %v4492_v18 }
 0x734   : > { %v1779_v32 = vpop.xlane.xlu1 %1778 }
 0x735   : > { %4362 = vrcp.f32 %v1779_v32 }
 0x738   : > { %v2043_v49 = vpop.permute.xlu1 %2042 }
 0x739   : > { %v2048_v55 = vsel %vm1099_vm7, %v2043_v49, 0 }
 0x73f   : > { %v4363_v33 = vpop.eup %4362  ;;  %v1782_v34 = vpop.xlane.xlu0 %1781 }
 0x740   : > { %v1791_v35 = vmul.f32 %v4363_v33, %v4355_v6  ;;  %4364 = vrcp.f32 %v1782_v34 }
 0x742   : > { %v1795_v36 = vpack.c.bf16 %v1791_v35, %v1791_v35 }
 0x743   : > { %v1993_v39 = vpop.permute.xlu0 %1992 }
 0x744   : > { %4061 = vmatmul.mubr.msk.bf16.vlgmr.msra.gmra.mrb[32].mxu0 %vm1099_vm7, %v1795_v36  ;;  %v1998_v44 = vsel %vm1099_vm7, %v1993_v39, 0 }
 0x745   : > { %4071 = vmatpush3.bf16.msra.mxu0 %v1948_v37  ;;  %4072 = vmatprep.mubr.msk.bf16.mxu0 %vm4493_vm6, %v4492_v18 }
 0x746   : > { %4082 = vmatprep.subr.bf16.mxu0 %v4492_v18 }
 0x747   : > { %v1991_v43 = vpop.permute.xlu0 %1990 }
 0x74a   : > { %v4365_v40 = vpop.eup %4364 }
 0x74b   : > { %v1792_v41 = vmul.f32 %v4365_v40, %v4357_v10  ;;  %v2093_v46 = vpop.permute.xlu0 %2092 }
 0x74c   : > { %v2098_v47 = vsel %vm1099_vm7, %v2093_v46, 0 }
 0x74d   : > { %v1796_v42 = vpack.c.bf16 %v1792_v41, %v1792_v41 }
 0x74f   : > { %4067 = vmatmul.mubr.msk.bf16.vlgmr.msra.gmra.mrb[24].mxu1 %vm1099_vm7, %v1796_v42  ;;  %v2091_v48 = vpop.permute.xlu0 %2090 }
 0x750   : > { %4077 = vmatpush3.bf16.xpose.msra.mxu1 %v1998_v44  ;;  %4078 = vmatprep.mubr.msk.bf16.mxu1 %vm4493_vm6, %v4492_v18 }
 0x751   : > { %4088 = vmatprep.subr.bf16.mxu1 %v4492_v18 }
 0x757   : > { %4079 = vmatmul.mubr.msk.bf16.vlgmr.msra.gmra.mrb[28].mxu1 %vm1099_vm7, %v1991_v43 }
 0x758   : > { %4089 = vmatpush3.bf16.xpose.msra.mxu1 %v2098_v47  ;;  %4090 = vmatprep.mubr.msk.bf16.mxu1 %vm4493_vm6, %v4492_v18 }
 0x759   : > { %4100 = vmatprep.subr.bf16.mxu1 %v4492_v18 }
 0x75f   : > { %4091 = vmatmul.mubr.msk.bf16.vlgmr.msra.gmra.mrb[32].mxu1 %vm1099_vm7, %v2091_v48 }
 0x760   : > { %4102 = vmatprep.mubr.msk.bf16.mxu1 %vm4493_vm6, %v4492_v18 }
 0x769   : > { %v1785_v50 = vpop.xlane.xlu1 %1784 }
 0x76a   : > { %4366 = vrcp.f32 %v1785_v50 }
 0x76d   : > { %v2041_v54 = vpop.permute.xlu1 %2040 }
 0x771   : > { %v2143_v56 = vpop.permute.xlu1 %2142 }
 0x772   : > { %v2148_v57 = vsel %vm1099_vm7, %v2143_v56, 0 }
 0x774   : > { %v4367_v51 = vpop.eup %4366 }
 0x775   : > { %v1793_v52 = vmul.f32 %v4367_v51, %v4359_v16  ;;  %v2141_v58 = vpop.permute.xlu1 %2140 }
 0x777   : > { %v1797_v53 = vpack.c.bf16 %v1793_v52, %v1793_v52 }
 0x779   : > { %4073 = vmatmul.mubr.msk.bf16.vlgmr.msra.gmra.mrb[36].mxu0 %vm1099_vm7, %v1797_v53 }
 0x77a   : > { %4083 = vmatpush3.bf16.xpose.msra.mxu0 %v2048_v55  ;;  %4084 = vmatprep.mubr.msk.bf16.mxu0 %vm4493_vm6, %v4492_v18 }
 0x77b   : > { %4094 = vmatprep.subr.bf16.mxu0 %v4492_v18 }
 0x781   : > { %4085 = vmatmul.mubr.msk.bf16.vlgmr.msra.gmra.mrb[40].mxu0 %vm1099_vm7, %v2041_v54 }
 0x782   : > { %4095 = vmatpush3.bf16.xpose.msra.mxu0 %v2148_v57  ;;  %4096 = vmatprep.mubr.msk.bf16.mxu0 %vm4493_vm6, %v4492_v18 }
 0x783   : > { %4106 = vmatprep.subr.bf16.mxu0 %v4492_v18 }
 0x789   : > { %4097 = vmatmul.mubr.msk.bf16.vlgmr.msra.gmra.mrb[44].mxu0 %vm1099_vm7, %v2141_v58 }
 0x78a   : > { %4108 = vmatprep.mubr.msk.bf16.mxu0 %vm4493_vm6, %v4492_v18 }
 0x7ed   : > { %v4924_v59 = vpop.f32.mrb[20].mxu1 }
 0x7ee   : > { %v4056_v60 = vpop.f32.mrb[21].mxu1 }
 0x7ef   : > { %v1843_v61 = vpop.f32.mrb[22].mxu1 }
 0x7f0   : > { %v4057_v62 = vpop.f32.mrb[23].mxu1 }
 0x817   : > { %v4926_v63 = vpop.f32.mrb[32].mxu0 }
 0x818   : > { %v4284_v0 = vpack.i.bf16 %v4926_v63, %v4924_v59  ;;  %v4062_v1 = vpop.f32.mrb[33].mxu0 }
 0x819   : > { %v1891_v2 = vpop.f32.mrb[34].mxu0 }
 0x81a   : > { %v4063_v3 = vpop.f32.mrb[35].mxu0 }
 0x822   : > { %v4930_v4 = vpop.f32.mrb[24].mxu1 }
 0x823   : > { %v4068_v5 = vpop.f32.mrb[25].mxu1 }
 0x824   : > { %v1939_v6 = vpop.f32.mrb[26].mxu1 }
 0x825   : > { %v4069_v8 = vpop.f32.mrb[27].mxu1 }
 0x82a   : > { %v2034_v10 = vpop.f32.mrb[28].mxu1 }
 0x82b   : > { %v2190_v11 = vmul.f32 0.35355338, %v2034_v10  ;;  %v4080_v12 = vpop.f32.mrb[29].mxu1 }
 0x82c   : > { %v2037_v13 = vpop.f32.mrb[30].mxu1 }
 0x82d   : > { %v4081_v14 = vpop.f32.mrb[31].mxu1  ;;  %v2194_v16 = vadd.f32 %v2190_v11, %v4782_v45 }
 0x82f   : > { %v2198_v17 = vsel %vm1099_vm7, %v2194_v16, -inf }
 0x830   : > { %2199 = vmax.xlane.f32.xlu0 %v2198_v17 }
 0x832   : > { %v2134_v19 = vpop.f32.mrb[32].mxu1 }
 0x833   : > { %v2192_v20 = vmul.f32 0.35355338, %v2134_v19  ;;  %v4092_v21 = vpop.f32.mrb[33].mxu1 }
 0x834   : > { %v2137_v22 = vpop.f32.mrb[34].mxu1 }
 0x835   : > { %v4093_v23 = vpop.f32.mrb[35].mxu1  ;;  %v2196_v24 = vadd.f32 %v2192_v20, %v4782_v45 }
 0x837   : > { %v2204_v26 = vsel %vm1099_vm7, %v2196_v24, -inf }
 0x838   : > { %2205 = vmax.xlane.f32.xlu0 %v2204_v26 }
 0x84c   : > { %v4936_v27 = vpop.f32.mrb[36].mxu0 }
 0x84d   : > { %v4289_v30 = vpack.i.bf16 %v4936_v27, %v4930_v4  ;;  %v4074_v32 = vpop.f32.mrb[37].mxu0 }
 0x84e   : > { %v1987_v33 = vpop.f32.mrb[38].mxu0 }
 0x84f   : > { %v4075_v34 = vpop.f32.mrb[39].mxu0 }
 0x854   : > { %v2084_v35 = vpop.f32.mrb[40].mxu0 }
 0x855   : > { %v2191_v36 = vmul.f32 0.35355338, %v2084_v35  ;;  %v4086_v37 = vpop.f32.mrb[41].mxu0 }
 0x856   : > { %v2087_v39 = vpop.f32.mrb[42].mxu0 }
 0x857   : > { %v4087_v40 = vpop.f32.mrb[43].mxu0  ;;  %v2195_v41 = vadd.f32 %v2191_v36, %v4782_v45 }
 0x859   : > { %v2201_v42 = vsel %vm1099_vm7, %v2195_v41, -inf }
 0x85a   : > { %2202 = vmax.xlane.f32.xlu1 %v2201_v42 }
 0x85c   : > { %v2184_v43 = vpop.f32.mrb[44].mxu0 }
 0x85d   : > { %v2193_v44 = vmul.f32 0.35355338, %v2184_v43  ;;  %v4098_v46 = vpop.f32.mrb[45].mxu0 }
 0x85e   : > { %v2187_v47 = vpop.f32.mrb[46].mxu0 }
 0x85f   : > { %v4099_v48 = vpop.f32.mrb[47].mxu0  ;;  %v2197_v49 = vadd.f32 %v2193_v44, %v4782_v45 }
 0x861   : > { %v2207_v50 = vsel %vm1099_vm7, %v2197_v49, -inf }
 0x862   : > { %2208 = vmax.xlane.f32.xlu0 %v2207_v50 }
 0x86b   : > { %2294 = vrot.lane.b32.xlu1 %v4748_v28, %s4502_s17 }
 0x86f   : > { %2342 = vrot.lane.b32.xlu1 %v4752_v29, %s4502_s17 }
 0x873   : > { %2390 = vrot.lane.b32.xlu1 %v4755_v31, %s4502_s17 }
 0x8bd   : > { %v2200_v51 = vpop.xlane.xlu0 %2199 }
 0x8be   : > { %v2210_v52 = vsub.f32 %v2194_v16, %v2200_v51 }
 0x8c0   : > { %v2214_v53 = vmul.f32 1.442695, %v2210_v52 }
 0x8c2   : > { %4368 = vpow2.f32 %v2214_v53 }
 0x8c5   : > { %v2206_v58 = vpop.xlane.xlu0 %2205 }
 0x8c6   : > { %v2212_v1 = vsub.f32 %v2196_v24, %v2206_v58 }
 0x8c8   : > { %v2218_v2 = vmul.f32 1.442695, %v2212_v1 }
 0x8cc   : > { %v4369_v54 = vpop.eup %4368 }
 0x8cd   : > { %v2222_v55 = vsel %vm1099_vm7, %v4369_v54, 0.0 }
 0x8ce   : > { %2223 = vadd.xlane.f32.xlu0 %v2222_v55 }
 0x8e4   : > { %2246 = vrot.lane.b32.xlu0 %v4746_v25, %s4502_s17  ;;  %s5247_s17 = scalar_lea.vmem %s5213_s13, %s4636_s22 }
 0x8e7   : > { %v2203_v56 = vpop.xlane.xlu1 %2202 }
 0x8e8   : > { %v2211_v57 = vsub.f32 %v2195_v41, %v2203_v56 }
 0x8ea   : > { %v2216_v60 = vmul.f32 1.442695, %v2211_v57 }
 0x8eb   : > { %v2295_v61 = vpop.permute.xlu1 %2294 }
 0x8ec   : > { %4370 = vpow2.f32 %v2216_v60  ;;  %v2300_v62 = vsel %vm1354_vm9, %v2295_v61, 0 }
 0x8ed   : > { %4107 = vmatpush3.bf16.msra.mxu0 %v2300_v62  ;;  %4372 = vpow2.f32 %v2218_v2 }
 0x8ee   : > { %4118 = vmatprep.subr.bf16.mxu0 %v4492_v18 }
 0x8ef   : > { %v2209_v10 = vpop.xlane.xlu0 %2208  ;;  %v2343_v22 = vpop.permute.xlu1 %2342 }
 0x8f0   : > { %v2213_v11 = vsub.f32 %v2197_v49, %v2209_v10  ;;  %v2348_v24 = vsel %vm1354_vm9, %v2343_v22, 0 }
 0x8f2   : > { %v2220_v12 = vmul.f32 1.442695, %v2213_v11 }
 0x8f3   : > { %v2391_v26 = vpop.permute.xlu1 %2390 }
 0x8f4   : > { %4374 = vpow2.f32 %v2220_v12  ;;  %v2396_v37 = vsel %vm1354_vm9, %v2391_v26, 0 }
 0x8f6   : > { %v4371_v3 = vpop.eup %4370 }
 0x8f7   : > { %v2225_v5 = vsel %vm1099_vm7, %v4371_v3, 0.0  ;;  %v4373_v6 = vpop.eup %4372 }
 0x8f8   : > { %2226 = vadd.xlane.f32.xlu1 %v2225_v5  ;;  %v2228_v8 = vsel %vm1099_vm7, %v4373_v6, 0.0 }
 0x8fe   : > { %v4375_v13 = vpop.eup %4374 }
 0x8ff   : > { %v2231_v14 = vsel %vm1099_vm7, %v4375_v13, 0.0 }
 0x903   : > { %2229 = vadd.xlane.f32.xlu0 %v2228_v8 }
 0x909   : > { %2490 = vrot.lane.b32.xlu1 %v4748_v28, %s4503_s18 }
 0x919   : > { %2440 = vrot.lane.b32.xlu0 %v4746_v25, %s4503_s18 }
 0x91d   : > { %2438 = vrot.lane.b32.xlu0 %v4746_v25, %s4504_s24 }
 0x921   : > { %2540 = vrot.lane.b32.xlu0 %v4752_v29, %s4503_s18 }
 0x925   : > { %2538 = vrot.lane.b32.xlu0 %v4752_v29, %s4504_s24 }
 0x92d   : > { %2232 = vadd.xlane.f32.xlu1 %v2231_v14 }
 0x93e   : > { %2488 = vrot.lane.b32.xlu1 %v4748_v28, %s4504_s24 }
 0x942   : > { %2590 = vrot.lane.b32.xlu1 %v4755_v31, %s4503_s18 }
 0x946   : > { %2588 = vrot.lane.b32.xlu1 %v4755_v31, %s4504_s24 }
 0x95b   : > { %v2224_v16 = vpop.xlane.xlu0 %2223 }
 0x95c   : > { %4376 = vrcp.f32 %v2224_v16 }
 0x95f   : > { %v2247_v17 = vpop.permute.xlu0 %2246 }
 0x960   : > { %v2252_v19 = vsel %vm1354_vm9, %v2247_v17, 0 }
 0x961   : > { %4101 = vmatpush3.bf16.msra.mxu1 %v2252_v19 }
 0x962   : > { %4112 = vmatprep.subr.bf16.mxu1 %v4492_v18 }
 0x966   : > { %v4377_v20 = vpop.eup %4376 }
 0x967   : > { %v2238_v21 = vmul.f32 %v4377_v20, %v4369_v54 }
 0x969   : > { %v2242_v23 = vpack.c.bf16 %v2238_v21, %v2238_v21 }
 0x96b   : > { %4103 = vmatmul.mubr.msk.bf16.vlgmr.msra.gmra.mrb[36].mxu1 %vm1099_vm7, %v2242_v23 }
 0x96c   : > { %4113 = vmatpush3.bf16.msra.mxu1 %v2348_v24  ;;  %4114 = vmatprep.mubr.msk.bf16.mxu1 %vm4493_vm6, %v4492_v18 }
 0x96d   : > { %4124 = vmatprep.subr.bf16.mxu1 %v4492_v18 }
 0x985   : > { %v2227_v32 = vpop.xlane.xlu1 %2226 }
 0x986   : > { %4378 = vrcp.f32 %v2227_v32 }
 0x989   : > { %v2491_v49 = vpop.permute.xlu1 %2490 }
 0x98a   : > { %v2496_v55 = vsel %vm1099_vm7, %v2491_v49, 0 }
 0x990   : > { %v4379_v33 = vpop.eup %4378  ;;  %v2230_v34 = vpop.xlane.xlu0 %2229 }
 0x991   : > { %v2239_v35 = vmul.f32 %v4379_v33, %v4371_v3  ;;  %4380 = vrcp.f32 %v2230_v34 }
 0x993   : > { %v2243_v36 = vpack.c.bf16 %v2239_v35, %v2239_v35 }
 0x994   : > { %v2441_v39 = vpop.permute.xlu0 %2440 }
 0x995   : > { %4109 = vmatmul.mubr.msk.bf16.vlgmr.msra.gmra.mrb[48].mxu0 %vm1099_vm7, %v2243_v36  ;;  %v2446_v44 = vsel %vm1099_vm7, %v2441_v39, 0 }
 0x996   : > { %4119 = vmatpush3.bf16.msra.mxu0 %v2396_v37  ;;  %4120 = vmatprep.mubr.msk.bf16.mxu0 %vm4493_vm6, %v4492_v18 }
 0x997   : > { %4130 = vmatprep.subr.bf16.mxu0 %v4492_v18 }
 0x998   : > { %v2439_v43 = vpop.permute.xlu0 %2438 }
 0x99b   : > { %v4381_v40 = vpop.eup %4380 }
 0x99c   : > { %v2240_v41 = vmul.f32 %v4381_v40, %v4373_v6  ;;  %v2541_v46 = vpop.permute.xlu0 %2540 }
 0x99d   : > { %v2546_v47 = vsel %vm1099_vm7, %v2541_v46, 0 }
 0x99e   : > { %v2244_v42 = vpack.c.bf16 %v2240_v41, %v2240_v41 }
 0x9a0   : > { %4115 = vmatmul.mubr.msk.bf16.vlgmr.msra.gmra.mrb[40].mxu1 %vm1099_vm7, %v2244_v42  ;;  %v2539_v48 = vpop.permute.xlu0 %2538 }
 0x9a1   : > { %4125 = vmatpush3.bf16.xpose.msra.mxu1 %v2446_v44  ;;  %4126 = vmatprep.mubr.msk.bf16.mxu1 %vm4493_vm6, %v4492_v18 }
 0x9a2   : > { %4136 = vmatprep.subr.bf16.mxu1 %v4492_v18 }
 0x9a8   : > { %4127 = vmatmul.mubr.msk.bf16.vlgmr.msra.gmra.mrb[44].mxu1 %vm1099_vm7, %v2439_v43 }
 0x9a9   : > { %4137 = vmatpush3.bf16.xpose.msra.mxu1 %v2546_v47  ;;  %4138 = vmatprep.mubr.msk.bf16.mxu1 %vm4493_vm6, %v4492_v18 }
 0x9aa   : > { %4148 = vmatprep.subr.bf16.mxu1 %v4492_v18 }
 0x9b0   : > { %4139 = vmatmul.mubr.msk.bf16.vlgmr.msra.gmra.mrb[48].mxu1 %vm1099_vm7, %v2539_v48 }
 0x9b1   : > { %4150 = vmatprep.mubr.msk.bf16.mxu1 %vm4493_vm6, %v4492_v18 }
 0x9ba   : > { %v2233_v50 = vpop.xlane.xlu1 %2232 }
 0x9bb   : > { %4382 = vrcp.f32 %v2233_v50 }
 0x9be   : > { %v2489_v54 = vpop.permute.xlu1 %2488 }
 0x9c2   : > { %v2591_v56 = vpop.permute.xlu1 %2590 }
 0x9c3   : > { %v2596_v57 = vsel %vm1099_vm7, %v2591_v56, 0 }
 0x9c5   : > { %v4383_v51 = vpop.eup %4382 }
 0x9c6   : > { %v2241_v52 = vmul.f32 %v4383_v51, %v4375_v13  ;;  %v2589_v58 = vpop.permute.xlu1 %2588 }
 0x9c8   : > { %v2245_v53 = vpack.c.bf16 %v2241_v52, %v2241_v52 }
 0x9ca   : > { %4121 = vmatmul.mubr.msk.bf16.vlgmr.msra.gmra.mrb[52].mxu0 %vm1099_vm7, %v2245_v53 }
 0x9cb   : > { %4131 = vmatpush3.bf16.xpose.msra.mxu0 %v2496_v55  ;;  %4132 = vmatprep.mubr.msk.bf16.mxu0 %vm4493_vm6, %v4492_v18 }
 0x9cc   : > { %4142 = vmatprep.subr.bf16.mxu0 %v4492_v18 }
 0x9d2   : > { %4133 = vmatmul.mubr.msk.bf16.vlgmr.msra.gmra.mrb[56].mxu0 %vm1099_vm7, %v2489_v54 }
 0x9d3   : > { %4143 = vmatpush3.bf16.xpose.msra.mxu0 %v2596_v57  ;;  %4144 = vmatprep.mubr.msk.bf16.mxu0 %vm4493_vm6, %v4492_v18 }
 0x9d4   : > { %4154 = vmatprep.subr.bf16.mxu0 %v4492_v18 }
 0x9da   : > { %4145 = vmatmul.mubr.msk.bf16.vlgmr.msra.gmra.mrb[60].mxu0 %vm1099_vm7, %v2589_v58 }
 0x9db   : > { %4156 = vmatprep.mubr.msk.bf16.mxu0 %vm4493_vm6, %v4492_v18 }
 0xa3e   : > { %v5000_v60 = vpop.f32.mrb[36].mxu1 }
 0xa3f   : > { %v4104_v61 = vpop.f32.mrb[37].mxu1 }
 0xa40   : > { %v2291_v62 = vpop.f32.mrb[38].mxu1 }
 0xa41   : > { %v4105_v1 = vpop.f32.mrb[39].mxu1 }
 0xa68   : > { %v5002_v2 = vpop.f32.mrb[48].mxu0 }
 0xa69   : > { %v4294_v3 = vpack.i.bf16 %v5002_v2, %v5000_v60  ;;  %v4110_v5 = vpop.f32.mrb[49].mxu0 }
 0xa6a   : > { %v2339_v6 = vpop.f32.mrb[50].mxu0 }
 0xa6b   : > { %v4111_v8 = vpop.f32.mrb[51].mxu0 }
 0xa73   : > { %v5006_v10 = vpop.f32.mrb[40].mxu1 }
 0xa74   : > { %v4116_v11 = vpop.f32.mrb[41].mxu1 }
 0xa75   : > { %v2387_v12 = vpop.f32.mrb[42].mxu1 }
 0xa76   : > { %v4117_v13 = vpop.f32.mrb[43].mxu1 }
 0xa7b   : > { %v2482_v14 = vpop.f32.mrb[44].mxu1 }
 0xa7c   : > { %v2638_v16 = vmul.f32 0.35355338, %v2482_v14  ;;  %v4128_v17 = vpop.f32.mrb[45].mxu1 }
 0xa7d   : > { %v2485_v19 = vpop.f32.mrb[46].mxu1 }
 0xa7e   : > { %v4129_v20 = vpop.f32.mrb[47].mxu1  ;;  %v2642_v21 = vadd.f32 %v2638_v16, %v4782_v45 }
 0xa80   : > { %v2646_v22 = vsel %vm1099_vm7, %v2642_v21, -inf }
 0xa81   : > { %2647 = vmax.xlane.f32.xlu0 %v2646_v22 }
 0xa83   : > { %v2582_v23 = vpop.f32.mrb[48].mxu1 }
 0xa84   : > { %v2640_v24 = vmul.f32 0.35355338, %v2582_v23  ;;  %v4140_v26 = vpop.f32.mrb[49].mxu1 }
 0xa85   : > { %v2585_v32 = vpop.f32.mrb[50].mxu1 }
 0xa86   : > { %v4141_v33 = vpop.f32.mrb[51].mxu1  ;;  %v2644_v34 = vadd.f32 %v2640_v24, %v4782_v45 }
 0xa88   : > { %v2652_v35 = vsel %vm1099_vm7, %v2644_v34, -inf }
 0xa89   : > { %2653 = vmax.xlane.f32.xlu0 %v2652_v35 }
 0xa9d   : > { %v2432_v36 = vpop.f32.mrb[52].mxu0 }
 0xa9e   : > { %v4299_v37 = vpack.i.bf16 %v2432_v36, %v5006_v10  ;;  %v4122_v39 = vpop.f32.mrb[53].mxu0 }
 0xa9f   : > { %v2435_v40 = vpop.f32.mrb[54].mxu0 }
 0xaa0   : > { %v4123_v41 = vpop.f32.mrb[55].mxu0 }
 0xaa5   : > { %v2532_v42 = vpop.f32.mrb[56].mxu0 }
 0xaa6   : > { %v2639_v43 = vmul.f32 0.35355338, %v2532_v42  ;;  %v4134_v44 = vpop.f32.mrb[57].mxu0 }
 0xaa7   : > { %v2535_v46 = vpop.f32.mrb[58].mxu0 }
 0xaa8   : > { %v4135_v47 = vpop.f32.mrb[59].mxu0  ;;  %v2643_v48 = vadd.f32 %v2639_v43, %v4782_v45  ;;  %v4316_v46 = vld [vmem:[%s4659_s20] sm:$0xff]  }
 0xaaa   : > { %v2649_v49 = vsel %vm1099_vm7, %v2643_v48, -inf }
 0xaab   : > { %2650 = vmax.xlane.f32.xlu1 %v2649_v49 }
 0xaad   : > { %v2632_v50 = vpop.f32.mrb[60].mxu0 }
 0xaae   : > { %v2641_v51 = vmul.f32 0.35355338, %v2632_v50  ;;  %v4146_v52 = vpop.f32.mrb[61].mxu0 }
 0xaaf   : > { %v2635_v53 = vpop.f32.mrb[62].mxu0 }
 0xab0   : > { %v4147_v54 = vpop.f32.mrb[63].mxu0  ;;  %v2645_v55 = vadd.f32 %v2641_v51, %v4782_v45 }
 0xab2   : > { %v2655_v56 = vsel %vm1099_vm7, %v2645_v55, -inf }
 0xab3   : > { %2656 = vmax.xlane.f32.xlu0 %v2655_v56 }
 0xb0e   : > { %v2648_v57 = vpop.xlane.xlu0 %2647 }
 0xb0f   : > { %v2658_v58 = vsub.f32 %v2642_v21, %v2648_v57 }
 0xb11   : > { %v2662_v61 = vmul.f32 1.442695, %v2658_v58 }
 0xb13   : > { %4384 = vpow2.f32 %v2662_v61 }
 0xb16   : > { %v2654_v62 = vpop.xlane.xlu0 %2653 }
 0xb17   : > { %v2660_v1 = vsub.f32 %v2644_v34, %v2654_v62 }
 0xb19   : > { %v2666_v5 = vmul.f32 1.442695, %v2660_v1 }
 0xb1b   : > { %4386 = vpow2.f32 %v2666_v5 }
 0xb1d   : > { %v4385_v6 = vpop.eup %4384 }
 0xb1e   : > { %v2670_v8 = vsel %vm1099_vm7, %v4385_v6, 0.0 }
 0xb1f   : > { %2671 = vadd.xlane.f32.xlu0 %v2670_v8 }
 0xb25   : > { %v4387_v10 = vpop.eup %4386 }
 0xb26   : > { %v2676_v11 = vsel %vm1099_vm7, %v4387_v10, 0.0 }
 0xb27   : > { %2677 = vadd.xlane.f32.xlu0 %v2676_v11 }
 0xb38   : > { %v2651_v45 = vpop.xlane.xlu1 %2650 }
 0xb39   : > { %v2659_v12 = vsub.f32 %v2643_v48, %v2651_v45 }
 0xb3b   : > { %v2664_v13 = vmul.f32 1.442695, %v2659_v12 }
 0xb3d   : > { %4388 = vpow2.f32 %v2664_v13  ;;  %2694 = vrot.lane.b32.xlu0 %v4746_v25, %s4505_s26 }
 0xb40   : > { %v2657_v17 = vpop.xlane.xlu0 %2656 }
 0xb41   : > { %4285 = vrot.lane.b32.xlu0 %v4284_v0, %s4506_s3  ;;  %v2661_v25 = vsub.f32 %v2645_v55, %v2657_v17  ;;  %v4317_v55 = vld [vmem:[%s4659_s20 + $0x8] sm:$0xff]   ;;  %s5250_s20 = sld [smem:[#allocation16_spill]] (!%p3863_p9) }
 0xb43   : > { %v2668_v19 = vmul.f32 1.442695, %v2661_v25 }
 0xb45   : > { %4295 = vrot.lane.b32.xlu0 %v4294_v3, %s4507_s8  ;;  %4390 = vpow2.f32 %v2668_v19 }
 0xb47   : > { %v4389_v14 = vpop.eup %4388 }
 0xb48   : > { %v2673_v16 = vsel %vm1099_vm7, %v4389_v14, 0.0 }
 0xb49   : > { %2674 = vadd.xlane.f32.xlu1 %v2673_v16 }
 0xb4f   : > { %v4391_v20 = vpop.eup %4390 }
 0xb50   : > { %v2679_v59 = vsel %vm1099_vm7, %v4391_v20, 0.0 }
 0xb5a   : > { %2742 = vrot.lane.b32.xlu1 %v4748_v28, %s4505_s26 }
 0xb5e   : > { %2790 = vrot.lane.b32.xlu1 %v4752_v29, %s4505_s26 }
 0xb82   : > { %2680 = vadd.xlane.f32.xlu1 %v2679_v59 }
 0xb93   : > { %2838 = vrot.lane.b32.xlu1 %v4755_v31, %s4505_s26 }
 0xb97   : > { %4290 = vrot.lane.b32.xlu1 %v4289_v30, %s4506_s3  ;;  %s5249_s3 = sld [smem:[#allocation15_spill]] (!%p3863_p9) }
 0xb9b   : > { %4300 = vrot.lane.b32.xlu1 %v4299_v37, %s4507_s8 }
 0xbac   : > { %v2672_v63 = vpop.xlane.xlu0 %2671 }
 0xbad   : > { %4392 = vrcp.f32 %v2672_v63 }
 0xbb4   : > { %v2678_v28 = vpop.xlane.xlu0 %2677 }
 0xbb5   : > { %4394 = vrcp.f32 %v2678_v28 }
 0xbb7   : > { %v4393_v0 = vpop.eup %4392 }
 0xbb8   : > { %v2686_v29 = vmul.f32 %v4393_v0, %v4385_v6  ;;  %v2695_v60 = vpop.permute.xlu0 %2694 }
 0xbb9   : > { %v2700_v2 = vsel %vm1354_vm9, %v2695_v60, 0 }
 0xbba   : > { %4149 = vmatpush3.bf16.msra.mxu1 %v2700_v2  ;;  %v2690_v3 = vpack.c.bf16 %v2686_v29, %v2686_v29 }
 0xbbb   : > { %4160 = vmatprep.subr.bf16.mxu1 %v4492_v18 }
 0xbbc   : > { %v4286_v1 = vpop.permute.xlu0 %4285 }
 0xbbd   : > { %4151 = vmatmul.mubr.msk.bf16.vlgmr.msra.gmra.mrb[52].mxu1 %vm1099_vm7, %v2690_v3  ;;  %v4288_v6 = vunpack.i.h.bf16 %v4286_v1  ;;  %v4287_v8 = vunpack.i.l.bf16 %v4286_v1 }
 0xbbe   : > { %4162 = vmatprep.mubr.msk.bf16.mxu1 %vm4493_vm6, %v4492_v18 }
 0xbbf   : > { %v4395_v4 = vpop.eup %4394  ;;  %v2935_v12 = vsel %vm1099_vm7, %v4852_v7, %v4288_v6  ;;  %v2934_v13 = vsel %vm1099_vm7, %v4854_v9, %v4287_v8 }
 0xbc0   : > { %v2688_v21 = vmul.f32 %v4395_v4, %v4387_v10  ;;  %v4296_v5 = vpop.permute.xlu0 %4295 }
 0xbc1   : > { %v4298_v10 = vunpack.i.h.bf16 %v4296_v5  ;;  %v4297_v11 = vunpack.i.l.bf16 %v4296_v5 }
 0xbc2   : > { %v2692_v26 = vpack.c.bf16 %v2688_v21, %v2688_v21 }
 0xbc3   : > { %v2939_v17 = vsel %vm2938_vm10, %v2934_v13, %v4297_v11  ;;  %v2940_v25 = vsel %vm2938_vm10, %v2935_v12, %v4298_v10 }
 0xbd6   : > { %v2675_v31 = vpop.xlane.xlu1 %2674 }
 0xbd7   : > { %4396 = vrcp.f32 %v2675_v31 }
 0xbda   : > { %v2743_v27 = vpop.permute.xlu1 %2742 }
 0xbdb   : > { %v2748_v30 = vsel %vm1354_vm9, %v2743_v27, 0 }
 0xbdc   : > { %4155 = vmatpush3.bf16.msra.mxu0 %v2748_v30 }
 0xbdd   : > { %4166 = vmatprep.subr.bf16.mxu0 %v4492_v18 }
 0xbde   : > { %v2791_v22 = vpop.permute.xlu1 %2790 }
 0xbdf   : > { %v2796_v23 = vsel %vm1354_vm9, %v2791_v22, 0 }
 0xbe0   : > { %4161 = vmatpush3.bf16.msra.mxu1 %v2796_v23 }
 0xbe1   : > { %v4397_v24 = vpop.eup %4396  ;;  %4172 = vmatprep.subr.bf16.mxu1 %v4316_v46 }
 0xbe2   : > { %v2687_v32 = vmul.f32 %v4397_v24, %v4389_v14 }
 0xbe3   : > { %4163 = vmatmul.mubr.msk.bf16.vlgmr.msra.gmra.mrb[56].mxu1 %vm1099_vm7, %v2692_v26 }
 0xbe4   : > { %v2691_v33 = vpack.c.bf16 %v2687_v32, %v2687_v32  ;;  %4173 = vmatpush3.bf16.msra.mxu1 %v4316_v46 }
 0xbe5   : > { %4174 = vmatprep.subr.bf16.mxu1 %v4317_v55 }
 0xbe6   : > { %4157 = vmatmul.mubr.msk.bf16.vlgmr.msra.gmra.mrb[64].mxu0 %vm1099_vm7, %v2691_v33 }
 0xbe7   : > { %4168 = vmatprep.mubr.msk.bf16.mxu0 %vm4493_vm6, %v4492_v18 }
 0xbe8   : > { %4175 = vmatpush3.bf16.msra.mxu1 %v4317_v55 }
 0xc0f   : > { %v2681_v34 = vpop.xlane.xlu1 %2680 }
 0xc10   : > { %4398 = vrcp.f32 %v2681_v34 }
 0xc13   : > { %v2839_v35 = vpop.permute.xlu1 %2838 }
 0xc14   : > { %v2844_v36 = vsel %vm1354_vm9, %v2839_v35, 0  ;;  %v4424_v35 = vld [vmem:[#allocation2] sm:$0xff] }
 0xc15   : > { %4167 = vmatpush3.bf16.msra.mxu0 %v2844_v36 }
 0xc17   : > { %v4291_v63 = vpop.permute.xlu1 %4290 }
 0xc18   : > { %v4293_v7 = vunpack.i.h.bf16 %v4291_v63  ;;  %v4292_v0 = vunpack.i.l.bf16 %v4291_v63 }
 0xc1a   : > { %v4399_v37 = vpop.eup %4398  ;;  %v2937_v2 = vsel %vm1099_vm7, %v4862_v38, %v4293_v7  ;;  %v2936_v3 = vsel %vm1099_vm7, %v4856_v15, %v4292_v0  ;;  %v3842_v38 = vld [vmem:[%s5246_s1] ss:$0 sm:$0xff] }
 0xc1b   : > { %v2689_v39 = vmul.f32 %v4399_v37, %v4391_v20  ;;  %v4301_v28 = vpop.permute.xlu1 %4300 }
 0xc1c   : > { %v4303_v29 = vunpack.i.h.bf16 %v4301_v28  ;;  %v4302_v9 = vunpack.i.l.bf16 %v4301_v28 }
 0xc1d   : > { %v2693_v40 = vpack.c.bf16 %v2689_v39, %v2689_v39  ;;  %v4425_v39 = vld [vmem:[#allocation2 + $0x10] sm:$0xff] }
 0xc1e   : > { %v2941_v27 = vsel %vm2938_vm10, %v2936_v3, %v4302_v9  ;;  %v2942_v30 = vsel %vm2938_vm10, %v2937_v2, %v4303_v29  ;;  %v3847_v3 = vld [vmem:[%s860_s16] ss:$0 sm:$0xff] }
 0xc1f   : > { %4169 = vmatmul.mubr.msk.bf16.vlgmr.msra.gmra.mrb[68].mxu0 %vm1099_vm7, %v2693_v40 }
 0xc90   : > { %v2736_v41 = vpop.f32.mrb[52].mxu1 }
 0xc91   : > { %v4152_v42 = vpop.f32.mrb[53].mxu1 }
 0xc92   : > { %v2739_v43 = vpop.f32.mrb[54].mxu1  ;;  %v4426_v42 = vld [vmem:[#allocation2 + $0x8] sm:$0xff] }
 0xc93   : > { %v4153_v44 = vpop.f32.mrb[55].mxu1 }
 0xcb6   : > { %v2832_v47 = vpop.f32.mrb[56].mxu1 }
 0xcb7   : > { %v4164_v18 = vpop.f32.mrb[57].mxu1 }
 0xcb8   : > { %v2835_v48 = vpop.f32.mrb[58].mxu1 }
 0xcb9   : > { %v2784_v49 = vpop.f32.mrb[64].mxu0  ;;  %v4165_v50 = vpop.f32.mrb[59].mxu1 }
 0xcba   : > { %v4304_v51 = vpack.i.bf16 %v2784_v49, %v2736_v41  ;;  %v4158_v52 = vpop.f32.mrb[65].mxu0 }
 0xcbb   : > { %v2787_v53 = vpop.f32.mrb[66].mxu0 }
 0xcbc   : > { %4305 = vrot.lane.b32.xlu0 %v4304_v51, %s4508_s29  ;;  %v4159_v54 = vpop.f32.mrb[67].mxu0 }
 0xcf2   : > { %v2880_v56 = vpop.f32.mrb[68].mxu0 }
 0xcf3   : > { %v4309_v57 = vpack.i.bf16 %v2880_v56, %v2832_v47  ;;  %v4170_v58 = vpop.f32.mrb[69].mxu0  ;;  %v4427_v47 = vld [vmem:[#allocation2 + $0x18] sm:$0xff] }
 0xcf4   : > { %v2883_v61 = vpop.f32.mrb[70].mxu0 }
 0xcf5   : > { %4310 = vrot.lane.b32.xlu1 %v4309_v57, %s4508_s29  ;;  %v4171_v62 = vpop.f32.mrb[71].mxu0 }
 0xd2e   : > { %v4306_v45 = vpop.permute.xlu0 %4305 }
 0xd2f   : > { %v4308_v14 = vunpack.i.h.bf16 %v4306_v45  ;;  %v4307_v16 = vunpack.i.l.bf16 %v4306_v45 }
 0xd31   : > { %v2945_v19 = vsel %vm2943_vm11, %v2940_v25, %v4308_v14  ;;  %v2944_v20 = vsel %vm2943_vm11, %v2939_v17, %v4307_v16  ;;  %v4318_v14 = vld [vmem:[%s4676_s6] sm:$0xff]   ;;  %v4319_v16 = vld [vmem:[%s4676_s6 + $0x8] sm:$0xff]   ;;  %s5251_s6 = sld [smem:[#allocation12_spill]] (!%p3863_p9) }
 0xd32   : > { %v2948_v59 = vpack.c.bf16 %v2945_v19, %v2944_v20  ;;  %4180 = vmatprep.subr.bf16.mxu0 %v4318_v14 }
 0xd33   : > { %4181 = vmatpush3.bf16.msra.mxu0 %v4318_v14 }
 0xd34   : > { %4176 = vmatprep.mubr.msk.bf16.mxu1 %vm932_vm5, %v2948_v59  ;;  %4182 = vmatprep.subr.bf16.mxu0 %v4319_v16 }
 0xd37   : > { %4183 = vmatpush3.bf16.msra.mxu0 %v4319_v16 }
 0xd67   : > { %v4311_v60 = vpop.permute.xlu1 %4310 }
 0xd68   : > { %v4313_v31 = vunpack.i.h.bf16 %v4311_v60  ;;  %v4312_v4 = vunpack.i.l.bf16 %v4311_v60 }
 0xd6a   : > { %v2947_v21 = vsel %vm2943_vm11, %v2942_v30, %v4313_v31  ;;  %v2946_v22 = vsel %vm2943_vm11, %v2941_v27, %v4312_v4 }
 0xd6b   : > { %v2949_v23 = vpack.c.bf16 %v2947_v21, %v2946_v22  ;;  %v3848_v22 = vld [vmem:[%s863_s21] ss:$0 sm:$0xff] }
 0xd6d   : > { %4177 = vmatmul.mubr.msk.bf16.vlgmr.msra.gmra.mrb[60].mxu1 %vm932_vm5, %v2949_v23 }
 0xe40   : > { %v4178_v24 = vpop.f32.mrb[60].mxu1 }
 0xe41   : > { %v3013_v15 = vpop.f32.mrb[61].mxu1  ;;  %v3022_v26 = vadd.f32 %v4178_v24, %v3842_v38 }
 0xe42   : > { %v3014_v32 = vadd.f32 %v3842_v38, %v3013_v15  ;;  %v4179_v33 = vpop.f32.mrb[62].mxu1 }
 0xe43   : > { %v3016_v34 = vpop.f32.mrb[63].mxu1  ;;  %v5075_v40 = vadd.f32 %v4425_v39, %v3022_v26  ;;  %v3025_v41 = vadd.f32 %v4179_v33, %v3842_v38 }
 0xe44   : > { %v5073_v36 = vadd.f32 %v4424_v35, %v3014_v32  ;;  %v3017_v37 = vadd.f32 %v3842_v38, %v3016_v34 }
 0xe45   : > { %v5083_v18 = vadd.f32 %v4427_v47, %v3025_v41  ;;  %v3040_v48 = vsel %vm932_vm5, %v5075_v40, 0.0  ;;  %v4323_v47 = vld [vmem:[%s4686_s25 + $0x18] sm:$0xff]  }
 0xe46   : > { %v5077_v43 = vadd.f32 %v4426_v42, %v3017_v37  ;;  %v3034_v44 = vsel %vm932_vm5, %v5073_v36, 0.0  ;;  %v4320_v42 = vld [vmem:[%s4686_s25] sm:$0xff]  }
 0xe47   : > { %3035 = vadd.xlane.f32.xlu0 %v3034_v44  ;;  %v3043_v49 = vsel %vm932_vm5, %v5083_v18, 0.0  ;;  %4188 = vmatprep.subr.bf16.mxu1 %v4320_v42  ;;  %v4321_v44 = vld [vmem:[%s4686_s25 + $0x8] sm:$0xff]  }
 0xe48   : > { %v3037_v46 = vsel %vm932_vm5, %v5077_v43, 0.0  ;;  %4189 = vmatpush3.bf16.msra.mxu1 %v4320_v42 }
 0xe49   : > { %3038 = vadd.xlane.f32.xlu1 %v3037_v46  ;;  %4190 = vmatprep.subr.bf16.mxu1 %v4321_v44  ;;  %v4322_v46 = vld [vmem:[%s4686_s25 + $0x10] sm:$0xff]  }
 0xe4b   : > { %3041 = vadd.xlane.f32.xlu0 %v3040_v48  ;;  %v4324_v48 = vld [vmem:[%s4686_s25 + $0x20] sm:$0xff]  }
 0xe4c   : > { %4191 = vmatpush3.bf16.msra.mxu1 %v4321_v44 }
 0xe4d   : > { %4192 = vmatprep.subr.bf16.mxu1 %v4322_v46 }
 0xe4f   : > { %3044 = vadd.xlane.f32.xlu0 %v3043_v49  ;;  %v4325_v49 = vld [vmem:[%s4686_s25 + $0x28] sm:$0xff]  }
 0xe50   : > { %4193 = vmatpush3.bf16.msra.mxu1 %v4322_v46 }
 0xe51   : > { %4194 = vmatprep.subr.bf16.mxu1 %v4323_v47 }
 0xe54   : > { %4195 = vmatpush3.bf16.msra.mxu1 %v4323_v47 }
 0xe55   : > { %4196 = vmatprep.subr.bf16.mxu1 %v4324_v48 }
 0xe58   : > { %4197 = vmatpush3.bf16.msra.mxu1 %v4324_v48 }
 0xe59   : > { %4198 = vmatprep.subr.bf16.mxu1 %v4325_v49 }
 0xe5c   : > { %4199 = vmatpush3.bf16.msra.mxu1 %v4325_v49 }
 0xed4   : > { %v3036_v50 = vpop.xlane.xlu0 %3035 }
 0xed5   : > { %v3046_v51 = vmul.f32 0.03125, %v3036_v50  ;;  %v4326_v50 = vld [vmem:[%s4686_s25 + $0x30] sm:$0xff]  }
 0xed6   : > { %v3039_v52 = vpop.xlane.xlu1 %3038  ;;  %4200 = vmatprep.subr.bf16.mxu1 %v4326_v50 }
 0xed7   : > { %v3050_v53 = vsub.f32 %v5073_v36, %v3046_v51  ;;  %v3047_v54 = vmul.f32 0.03125, %v3039_v52  ;;  %4201 = vmatpush3.bf16.msra.mxu1 %v4326_v50  ;;  %v4327_v51 = vld [vmem:[%s4686_s25 + $0x38] sm:$0xff]   ;;  %v3849_v52 = vld [vmem:[%s5247_s17] ss:$0 sm:$0xff] }
 0xed8   : > { %v3042_v55 = vpop.xlane.xlu0 %3041  ;;  %4202 = vmatprep.subr.bf16.mxu1 %v4327_v51 }
 0xed9   : > { %v3051_v56 = vsub.f32 %v5077_v43, %v3047_v54  ;;  %v3048_v57 = vmul.f32 0.03125, %v3042_v55  ;;  %v3054_v58 = vmul.f32 %v3050_v53, %v3050_v53 }
 0xedb   : > { %v3052_v61 = vsub.f32 %v5075_v40, %v3048_v57  ;;  %v3058_v62 = vsel %vm932_vm5, %v3054_v58, 0.0  ;;  %v3055_v1 = vmul.f32 %v3051_v56, %v3051_v56  ;;  %4203 = vmatpush3.bf16.msra.mxu1 %v4327_v51 }
 0xedc   : > { %3059 = vadd.xlane.f32.xlu0 %v3058_v62  ;;  %v3045_v5 = vpop.xlane.xlu0 %3044 }
 0xedd   : > { %v3049_v6 = vmul.f32 0.03125, %v3045_v5  ;;  %v3061_v8 = vsel %vm932_vm5, %v3055_v1, 0.0  ;;  %v3056_v10 = vmul.f32 %v3052_v61, %v3052_v61 }
 0xede   : > { %3062 = vadd.xlane.f32.xlu1 %v3061_v8 }
 0xedf   : > { %v3053_v11 = vsub.f32 %v5083_v18, %v3049_v6  ;;  %v3064_v45 = vsel %vm932_vm5, %v3056_v10, 0.0 }
 0xee0   : > { %3065 = vadd.xlane.f32.xlu0 %v3064_v45 }
 0xee1   : > { %v3057_v12 = vmul.f32 %v3053_v11, %v3053_v11 }
 0xee3   : > { %v3067_v13 = vsel %vm932_vm5, %v3057_v12, 0.0 }
 0xee4   : > { %3068 = vadd.xlane.f32.xlu1 %v3067_v13 }
 0xf69   : > { %v3060_v17 = vpop.xlane.xlu0 %3059 }
 0xf6a   : > { %v3070_v25 = vmul.f32 0.03125, %v3060_v17 }
 0xf6b   : > { %v3063_v19 = vpop.xlane.xlu1 %3062 }
 0xf6c   : > { %v3074_v20 = vadd.f32 1e-05, %v3070_v25  ;;  %v3071_v59 = vmul.f32 0.03125, %v3063_v19 }
 0xf6d   : > { %v3066_v63 = vpop.xlane.xlu0 %3065 }
 0xf6e   : > { %4400 = vrsqrt.f32 %v3074_v20  ;;  %v3075_v28 = vadd.f32 1e-05, %v3071_v59  ;;  %v3072_v7 = vmul.f32 0.03125, %v3066_v63 }
 0xf70   : > { %4402 = vrsqrt.f32 %v3075_v28  ;;  %v3076_v0 = vadd.f32 1e-05, %v3072_v7 }
 0xf71   : > { %v3069_v29 = vpop.xlane.xlu1 %3068 }
 0xf72   : > { %4404 = vrsqrt.f32 %v3076_v0  ;;  %v3073_v9 = vmul.f32 0.03125, %v3069_v29 }
 0xf74   : > { %v3077_v60 = vadd.f32 1e-05, %v3073_v9 }
 0xf76   : > { %4406 = vrsqrt.f32 %v3077_v60 }
 0xf78   : > { %v4401_v2 = vpop.eup %4400 }
 0xf79   : > { %v3082_v31 = vmul.f32 %v4401_v2, %v3050_v53 }
 0xf7a   : > { %v4403_v4 = vpop.eup %4402 }
 0xf7b   : > { %v3083_v27 = vmul.f32 %v4403_v4, %v3051_v56  ;;  %v3092_v30 = vmul.f32 %v3847_v3, %v3082_v31 }
 0xf7c   : > { %v4405_v21 = vpop.eup %4404 }
 0xf7d   : > { %v3084_v23 = vmul.f32 %v4405_v21, %v3052_v61  ;;  %v3093_v38 = vmul.f32 %v3847_v3, %v3083_v27  ;;  %v3102_v24 = vadd.f32 %v3848_v22, %v3092_v30  ;;  %v3862_v27 = vld [vmem:[%s879_s28] ss:$0 sm:$0xff]  ;;  %s5248_s28 = sld [smem:[#allocation17_spill]] (!%p3863_p9) }
 0xf7f   : > { %v3103_v15 = vadd.f32 %v3848_v22, %v3093_v38  ;;  %v3094_v32 = vmul.f32 %v3847_v3, %v3084_v23 }
 0xf80   : > { %v4407_v26 = vpop.eup %4406 }
 0xf81   : > { %v3085_v33 = vmul.f32 %v4407_v26, %v3053_v11  ;;  %v3106_v34 = vpack.c.bf16 %v3103_v15, %v3102_v24  ;;  %v3104_v37 = vadd.f32 %v3848_v22, %v3094_v32 }
 0xf83   : > { %v3095_v35 = vmul.f32 %v3847_v3, %v3085_v33  ;;  %4184 = vmatprep.mubr.msk.bf16.mxu0 %vm932_vm5, %v3106_v34 }
 0xf85   : > { %v3105_v39 = vadd.f32 %v3848_v22, %v3095_v35 }
 0xf87   : > { %v3107_v41 = vpack.c.bf16 %v3105_v39, %v3104_v37 }
 0xf89   : > { %4185 = vmatmul.mubr.msk.bf16.vlgmr.msra.gmra.mrb[72].mxu0 %vm932_vm5, %v3107_v41 }
0x105c   : > { %v4186_v53 = vpop.f32.mrb[72].mxu0 }
0x105d   : > { %v3180_v54 = vadd.f32 %v4186_v53, %v3849_v52  ;;  %v3171_v55 = vpop.f32.mrb[73].mxu0 }
0x105e   : > { %v3172_v56 = vadd.f32 %v3849_v52, %v3171_v55  ;;  %v4187_v57 = vpop.f32.mrb[74].mxu0 }
0x105f   : > { %v3188_v58 = vmul.f32 -1.702, %v3180_v54  ;;  %v3183_v61 = vadd.f32 %v4187_v57, %v3849_v52  ;;  %v3174_v62 = vpop.f32.mrb[75].mxu0 }
0x1060   : > { %v3186_v1 = vmul.f32 -1.702, %v3172_v56  ;;  %v3175_v5 = vadd.f32 %v3849_v52, %v3174_v62  ;;  %v4509_v62 = vmov (!%p3863_p9), 0.0|0.0  }
0x1061   : > { %v3194_v6 = vmul.f32 1.442695, %v3188_v58  ;;  %v3189_v8 = vmul.f32 -1.702, %v3183_v61  ;;  %4227 = vmatprep.subr.bf16.mxu0 (!%p3863_p9), %v4509_v62 }
0x1062   : > { %v3190_v10 = vmul.f32 1.442695, %v3186_v1  ;;  %v3187_v11 = vmul.f32 -1.702, %v3175_v5  ;;  %v4511_v1 = vmov (!%p3863_p9), 0.0  }
0x1063   : > { %4408 = vpow2.f32 %v3194_v6  ;;  %v3196_v45 = vmul.f32 1.442695, %v3189_v8  ;;  %4216 = vmatprep.mubr.msk.f32.mxu0 (!%p3863_p9), %vm4510_vm12, %v4511_v1  ;;  %4219 = vmatprep.subr.bf16.mxu1 (!%p3863_p9), %v4511_v1 }
0x1064   : > { %4410 = vpow2.f32 %v3190_v10  ;;  %v3192_v12 = vmul.f32 1.442695, %v3187_v11 }
0x1065   : > { %4412 = vpow2.f32 %v3196_v45 }
0x1066   : > { %4414 = vpow2.f32 %v3192_v12 }
0x106d   : > { %v4409_v13 = vpop.eup %4408 }
0x106e   : > { %v4411_v14 = vpop.eup %4410  ;;  %v3200_v16 = vadd.f32 1.0, %v4409_v13 }
0x106f   : > { %v4413_v17 = vpop.eup %4412  ;;  %v3198_v25 = vadd.f32 1.0, %v4411_v14 }
0x1070   : > { %v4415_v19 = vpop.eup %4414  ;;  %4416 = vrcp.f32 %v3200_v16  ;;  %v3201_v20 = vadd.f32 1.0, %v4413_v17 }
0x1071   : > { %4418 = vrcp.f32 %v3198_v25  ;;  %v3199_v59 = vadd.f32 1.0, %v4415_v19 }
0x1072   : > { %4420 = vrcp.f32 %v3201_v20 }
0x1073   : > { %4422 = vrcp.f32 %v3199_v59 }
0x107a   : > { %v4417_v63 = vpop.eup %4416 }
0x107b   : > { %v4419_v28 = vpop.eup %4418  ;;  %v3208_v29 = vmul.f32 %v4417_v63, %v3180_v54  ;;  %v3864_v63 = vld [vmem:[%s5249_s3] ss:$0 sm:$0xff] (!%p3863_p9) }
0x107c   : > { %v4421_v7 = vpop.eup %4420  ;;  %v3206_v60 = vmul.f32 %v4419_v28, %v3172_v56 }
0x107d   : > { %v4423_v0 = vpop.eup %4422  ;;  %v3209_v9 = vmul.f32 %v4421_v7, %v3183_v61 }
0x107e   : > { %v3207_v2 = vmul.f32 %v4423_v0, %v3175_v5  ;;  %v4428_v5 = vld [vmem:[%s5248_s28] sm:$0xff] (!%p3863_p9)  }
0x107f   : > { %v3211_v3 = vpack.c.bf16 %v3209_v9, %v3208_v29  ;;  %v3865_v9 = vld [vmem:[%s5250_s20] ss:$0 sm:$0xff] (!%p3863_p9) }
0x1080   : > { %v3210_v31 = vpack.c.bf16 %v3207_v2, %v3206_v60 }
0x1082   : > { %4204 = vmatprep.mubr.bf16.mxu1 %v3210_v31 }
0x1083   : > { %4205 = vmatmul.mubr.bf16.vlgmr.msra.gmra.mrb[64].mxu1 %v3211_v3 }
0x1084   : > { %4223 = vmatprep.mubr.msk.bf16.mxu1 (!%p3863_p9), %vm4510_vm12, %v4511_v1  ;;  %4220 = vmatpush3.bf16.msra.mxu1 (!%p3863_p9), %v4428_v5 }
0x1085   : > { %4221 = vmatprep.subr.bf16.mxu1 (!%p3863_p9), %v4511_v1 }
0x1156   : > { %v4206_v4 = vpop.f32.mrb[64].mxu1 }
0x1157   : > { %v3327_v30 = vadd.f32 %v4206_v4, %v5075_v40  ;;  %v3310_v21 = vpop.f32.mrb[65].mxu1 }
0x1158   : > { %v3325_v22 = vadd.f32 %v3310_v21, %v5073_v36  ;;  %v4207_v23 = vpop.f32.mrb[66].mxu1  ;;  %3347 = sbr.rel (%p3863_p9) target bundleno = 5199 (0x144f), region = 108 }
0x1159   : > { %v3338_v38 = vadd.f32 %v3862_v27, %v3327_v30  ;;  %v3328_v24 = vadd.f32 %v4207_v23, %v5083_v18  ;;  %v3313_v15 = vpop.f32.mrb[67].mxu1 }
0x115a   : > { %v3336_v26 = vadd.f32 %v3862_v27, %v3325_v22  ;;  %v3326_v32 = vadd.f32 %v3313_v15, %v5077_v43  ;;  %v3422_v15 = vld [vmem:[%s5251_s6] sm:$0xf] (!%p3863_p9) }
0x115b   : > { %3342 = vst.msk [vmem:[#allocation2 + $0x10] sm:$0xff] %vm932_vm5, %v3338_v38  ;;  %v3339_v33 = vadd.f32 %v3862_v27, %v3328_v24  ;;  %v3356_v40 = vsel (!%p3863_p9), %vm932_vm5, %v3338_v38, 0.0 }
0x115c   : > { %3340 = vst.msk [vmem:[#allocation2] sm:$0xff] %vm932_vm5, %v3336_v26  ;;  %v3337_v34 = vadd.f32 %v3862_v27, %v3326_v32  ;;  %v3350_v36 = vsel (!%p3863_p9), %vm932_vm5, %v3336_v26, 0.0  ;;  %3357 = vadd.xlane.f32.xlu1 (!%p3863_p9), %v3356_v40 }
0x115d   : > { %3343 = vst.msk [vmem:[#allocation2 + $0x18] sm:$0xff] %vm932_vm5, %v3339_v33  ;;  %3351 = vadd.xlane.f32.xlu0 (!%p3863_p9), %v3350_v36  ;;  %v3359_v18 = vsel (!%p3863_p9), %vm932_vm5, %v3339_v33, 0.0 }
0x115e   : > { %3341 = vst.msk [vmem:[#allocation2 + $0x8] sm:$0xff] %vm932_vm5, %v3337_v34  ;;  %v3353_v43 = vsel (!%p3863_p9), %vm932_vm5, %v3337_v34, 0.0 }
0x1160   : > { %3360 = vadd.xlane.f32.xlu1 %v3359_v18 }
0x1161   : > { %3354 = vadd.xlane.f32.xlu0 %v3353_v43 }
0x11e9   : > { %v3358_v37 = vpop.xlane.xlu1 %3357 }
0x11ea   : > { %v3352_v35 = vpop.xlane.xlu0 %3351  ;;  %v3364_v41 = vmul.f32 0.03125, %v3358_v37 }
0x11eb   : > { %v3362_v39 = vmul.f32 0.03125, %v3352_v35 }
0x11ec   : > { %v3368_v44 = vsub.f32 %v3338_v38, %v3364_v41 }
0x11ed   : > { %v3366_v42 = vsub.f32 %v3336_v26, %v3362_v39  ;;  %v3361_v47 = vpop.xlane.xlu1 %3360  ;;  %v4429_v26 = vld [vmem:[%s5248_s28 + $0x8] sm:$0xff]  }
0x11ee   : > { %v3355_v46 = vpop.xlane.xlu0 %3354  ;;  %v3365_v49 = vmul.f32 0.03125, %v3361_v47  ;;  %v3372_v51 = vmul.f32 %v3368_v44, %v3368_v44  ;;  %4222 = vmatpush3.bf16.msra.mxu1 %v4429_v26 }
0x11ef   : > { %v3363_v48 = vmul.f32 0.03125, %v3355_v46  ;;  %v3370_v50 = vmul.f32 %v3366_v42, %v3366_v42 }
0x11f0   : > { %v3369_v53 = vsub.f32 %v3339_v33, %v3365_v49  ;;  %v3380_v55 = vsel %vm932_vm5, %v3372_v51, 0.0 }
0x11f1   : > { %v3367_v52 = vsub.f32 %v3337_v34, %v3363_v48  ;;  %v3374_v54 = vsel %vm932_vm5, %v3370_v50, 0.0 }
0x11f2   : > { %3375 = vadd.xlane.f32.xlu0 %v3374_v54  ;;  %v3373_v57 = vmul.f32 %v3369_v53, %v3369_v53 }
0x11f3   : > { %v3371_v56 = vmul.f32 %v3367_v52, %v3367_v52 }
0x11f4   : > { %v3383_v61 = vsel %vm932_vm5, %v3373_v57, 0.0 }
0x11f5   : > { %v3377_v58 = vsel %vm932_vm5, %v3371_v56, 0.0 }
0x11f6   : > { %3381 = vadd.xlane.f32.xlu0 %v3380_v55  ;;  %3378 = vadd.xlane.f32.xlu1 %v3377_v58 }
0x11fa   : > { %3384 = vadd.xlane.f32.xlu1 %v3383_v61 }
0x127f   : > { %v3376_v6 = vpop.xlane.xlu0 %3375 }
0x1280   : > { %v3386_v8 = vmul.f32 0.03125, %v3376_v6 }
0x1282   : > { %v3390_v10 = vadd.f32 1e-05, %v3386_v8 }
0x1283   : > { %v3379_v11 = vpop.xlane.xlu1 %3378  ;;  %v3382_v45 = vpop.xlane.xlu0 %3381 }
0x1284   : > { %4430 = vrsqrt.f32 %v3390_v10  ;;  %v3387_v12 = vmul.f32 0.03125, %v3379_v11  ;;  %v3388_v13 = vmul.f32 0.03125, %v3382_v45 }
0x1286   : > { %v3391_v14 = vadd.f32 1e-05, %v3387_v12  ;;  %v3392_v16 = vadd.f32 1e-05, %v3388_v13 }
0x1287   : > { %v3385_v17 = vpop.xlane.xlu1 %3384 }
0x1288   : > { %4432 = vrsqrt.f32 %v3391_v14  ;;  %v3389_v25 = vmul.f32 0.03125, %v3385_v17 }
0x1289   : > { %4434 = vrsqrt.f32 %v3392_v16 }
0x128a   : > { %v3393_v19 = vadd.f32 1e-05, %v3389_v25 }
0x128c   : > { %4436 = vrsqrt.f32 %v3393_v19 }
0x128e   : > { %v4431_v20 = vpop.eup %4430 }
0x128f   : > { %v3398_v59 = vmul.f32 %v4431_v20, %v3366_v42 }
0x1291   : > { %v3408_v29 = vmul.f32 %v3864_v63, %v3398_v59 }
0x1292   : > { %v4433_v28 = vpop.eup %4432 }
0x1293   : > { %v4435_v7 = vpop.eup %4434  ;;  %v3399_v0 = vmul.f32 %v4433_v28, %v3367_v52  ;;  %v3418_v31 = vadd.f32 %v3865_v9, %v3408_v29 }
0x1294   : > { %v3400_v60 = vmul.f32 %v4435_v7, %v3368_v44 }
0x1295   : > { %v3409_v2 = vmul.f32 %v3864_v63, %v3399_v0 }
0x1296   : > { %v4437_v3 = vpop.eup %4436  ;;  %v3410_v30 = vmul.f32 %v3864_v63, %v3400_v60 }
0x1297   : > { %v3419_v4 = vadd.f32 %v3865_v9, %v3409_v2  ;;  %v3401_v27 = vmul.f32 %v4437_v3, %v3369_v53 }
0x1298   : > { %v3420_v23 = vadd.f32 %v3865_v9, %v3410_v30 }
0x1299   : > { %v4228_v21 = vpack.c.bf16 %v3419_v4, %v3418_v31  ;;  %v3411_v22 = vmul.f32 %v3864_v63, %v3401_v27 }
0x129b   : > { %4229 = vmatpush3.bf16.msra.mxu0 %v4228_v21  ;;  %v3421_v38 = vadd.f32 %v3865_v9, %v3411_v22 }
0x129c   : > { %4230 = vmatprep.subr.bf16.mxu0 %v4509_v62 }
0x129d   : > { %v4231_v24 = vpack.c.bf16 %v3421_v38, %v3420_v23 }
0x129f   : > { %4232 = vmatpush3.bf16.msra.mxu0 %v4231_v24 }
0x12a2   : > { %4217 = vmatmul.mubr.msk.f32.vlgmr.msra.gmra.mrb[0].mxu0 %vm932_vm5, %v3422_v15 }
0x1375   : > { %v3492_v32 = vpop.f32.mrb[0].mxu0 }
0x1376   : > { %v3496_v33 = vpack.c.bf16 %v3492_v32, %v3492_v32  ;;  %v4218_v34 = vpop.f32.mrb[1].mxu0 }
0x1378   : > { %4224 = vmatmul.mubr.msk.bf16.vlgmr.msra.gmra.mrb[0].mxu1 %vm932_vm5, %v3496_v33 }
0x144b   : > { %v3550_v36 = vpop.f32.mrb[0].mxu1 }
0x144c   : > { %3556 = vst [vmem:[#allocation3] sm:$0xf] %v3550_v36  ;;  %v4225_v40 = vpop.f32.mrb[1].mxu1 }
0x144d   : > { %v3553_v43 = vpop.f32.mrb[2].mxu1 }
0x144e   : > { %v4226_v18 = vpop.f32.mrb[3].mxu1 }
0x144f PF: > { %s5252_s30 = sld [smem:[#allocation7_spill]]  ;;  %s4512_s17 = smov [#allocation3]  }
0x1450   : > { %s3566_s25 = sshll.u32 %s4512_s17, 4  ;;  %s3567_s25 = int_to_ptr.vmem [resolvable:$true] %s3566_s25 }
0x1451   : > { %s4438_s18 = scalar_lea.vmem %s3567_s25, 64  ;;  %p4445_p0 = scmp.lt.s32.totalorder %s3567_s25, %s3567_s25 }
0x1452   : > { %p4439_p11 = scmp.ne.s32.totalorder %s3567_s25, %s4438_s18  ;;  %p4446_p1 = scmp.lt.s32.totalorder %s4438_s18, %s4438_s18 }
0x1454   : > { %p4447_p2 = por %p4446_p1, %p4445_p0 }
0x1455   : > { %s5253_s16 = sadd.s32 4294967295, %s5252_s30  }
0x1456   : > { %p5165_p10 = scmp.eq.s32.totalorder %s5253_s16, 1 }
0x1458   : > { %p4440_p12 = pnand %p4439_p11, %p5165_p10 }
0x145a   : > { %p4441_p13 = pneg %p4440_p12 }
0x145c   : > { %p4448_p3 = pnand %p4447_p2, %p4441_p13 }
0x145e   : > { %4451 = shalt.err (!%p4448_p3)
}
0x145f   : > { %s5255_s24 = sld [smem:[#allocation18_spill]] }
0x1465   : > { %s4452_s26 = scalar_lea.hbm %s5255_s24, 64 }
0x1466   : > { %p4453_p4 = scmp.ne.s32.totalorder %s5255_s24, %s4452_s26  ;;  %p4458_p7 = scmp.lt.u32.totalorder %s4452_s26, %s5255_s24 }
0x1468   : > { %p4454_p5 = pnand %p4453_p4, %p5165_p10 }
0x146a   : > { %p4455_p6 = pneg %p4454_p5 }
0x146c   : > { %p4460_p8 = pnand %p4458_p7, %p4455_p6 }
0x146e   : > { %4463 = shalt.err (!%p4460_p8)
}
0x146f   : > { %4234 = dma.vmem_to_hbm [thread:$0]  (%p5165_p10), %s3567_s25, 64, %s5255_s24, [#allocation4]  }
0x1470   : > { %4477 = dma.done.wait (%p5165_p10), [#allocation4], 64  }
0x1471   : > { %4479 = vsyncadd (%p5165_p10), [#allocation4], 4294967232 }
0x1472 PF: > { %s5256_s6 = sld [smem:[#allocation7_spill]]  ;;  %s5257_s0 = sld [smem:[#allocation6_spill]] }
0x1473   : > { %s5258_s30 = sld [smem:[#allocation8_spill]] }
0x1478   : > { %s30_s20 = sadd.s32 1, %s5256_s6  }
0x1479   : > { %p27_p9 = scmp.ge.s32.totalorder %s30_s20, 4  }
0x147b   :  { %29 = sbr.rel (!%p27_p9) target bundleno = 13 (0xd), region = 178 }
0x1482   :  { %3579 = vsyncpa [#allocation4], 1 }
0x1483   :  { %3581 = vsyncpa [#allocation4 + $0x1], 1 }

</bundles_post_ra>
